<compile_context>
chip_gen: v5e
topology: v5e:2x2
jax: 0.10.0
libtpu: 0.0.40
codegen_flags: <defaults>
</compile_context>

<pallas_src>
import jax
import jax.numpy as jnp
from jax.experimental import pallas as pl
from jax.experimental.pallas import tpu as pltpu

B = 2            # batch
L = 400          # sequence length (fixed by Linear(flat_size = 64 * 400, 1))
C_IN = 3
C_OUT = 64
K = 3            # conv kernel size
KC1 = K * C_IN + 1   # 10 = 9 conv taps + constant-1 row for the folded BN shift
NEG_SLOPE = 0.01     # nn.LeakyReLU default
EPS = 1e-5           # nn.BatchNorm1d default


def cnn_kernel(xcol_ref, wf_ref, lwt_ref, lb_ref, out_ref):
    # xcol_ref: (B, KC1, L)  im2col(+ones) input, lane axis = L
    # wf_ref:   (C_OUT, KC1) conv taps * BN scale; last column = BN shift
    # lwt_ref:  (C_OUT, L)   Linear weight in channel-major flatten order
    # lb_ref:   (1, 1)       Linear bias (SMEM scalar)
    # out_ref:  (B, 1)
    wf = wf_ref[...]                                            # (C_OUT, KC1)
    lwt = lwt_ref[...]                                          # (C_OUT, L)

    cols = []
    for b in range(B):                                          # static unroll (B=2)
        # Fused conv + bias + BatchNorm(eval): one lane-dense MXU matmul.
        conv = jnp.dot(wf, xcol_ref[b],
                       preferred_element_type=jnp.float32,
                       precision=jax.lax.Precision.HIGHEST)     # (C_OUT, L)
        # LeakyReLU (Dropout is identity in eval mode).
        act = jnp.where(conv > 0, conv, NEG_SLOPE * conv)       # (C_OUT, L)
        # Final Linear, part 1: elementwise product + sublane (VPU) reduce.
        prod = act * lwt                                        # (C_OUT, L)
        cols.append(jnp.sum(prod, axis=0, keepdims=True))       # (1, L)

    col = jnp.concatenate(cols, axis=0)                         # (B, L)
    # Final Linear, part 2: one small cross-lane (XLU) reduce + bias.
    out_ref[...] = jnp.sum(col, axis=1, keepdims=True) + lb_ref[0, 0]


def cnn_forward(x, p):
    """x: (B, L, C_IN) float32 -> (B, 1) float32 (eval-mode CNN forward)."""
    Bx, Lx, Cx = x.shape
    assert (Bx, Lx, Cx) == (B, L, C_IN)
    x = x.astype(jnp.float32)

    # ---- one-time glue in plain JAX: im2col slab + weight folding ----------
    xp = jnp.pad(x, ((0, 0), (1, 1), (0, 0)))                    # (B, L+2, C_IN)
    taps = [xp[:, k:k + L, :] for k in range(K)]                 # each (B, L, C_IN)
    xcol = jnp.concatenate(taps + [jnp.ones((B, L, 1), jnp.float32)],
                           axis=-1)                              # (B, L, KC1)
    xcolT = jnp.transpose(xcol, (0, 2, 1))                       # (B, KC1, L)

    # Fold conv bias + BatchNorm1d(eval) into the fused weight:
    #   scale into the taps, shift into the extra (constant-1) contraction row.
    scale = p['gamma'] / jnp.sqrt(p['rvar'] + EPS)               # (C_OUT,)
    shift = p['beta'] + (p['cbias'] - p['rmean']) * scale        # (C_OUT,)
    # w9[o, k*C_IN + c] = wconv[o, c, k] * scale[o]   (matches xcol tap order)
    w9 = (jnp.transpose(p['wconv'], (0, 2, 1)).reshape(C_OUT, K * C_IN)
          * scale[:, None])                                      # (C_OUT, 9)
    wf = jnp.concatenate([w9, shift[:, None]], axis=1)           # (C_OUT, KC1)

    # PyTorch flattens (B, C_OUT, L) channel-major: flat idx = c*L + l.
    lwt = p['lW'].reshape(C_OUT, L)                              # (C_OUT, L)
    lb = p['lb'].reshape(1, 1)

    return pl.pallas_call(
        cnn_kernel,
        out_shape=jax.ShapeDtypeStruct((B, 1), jnp.float32),
        in_specs=[
            pl.BlockSpec(memory_space=pltpu.MemorySpace.VMEM),   # xcolT
            pl.BlockSpec(memory_space=pltpu.MemorySpace.VMEM),   # fused conv/BN W
            pl.BlockSpec(memory_space=pltpu.MemorySpace.VMEM),   # linear W
            pl.BlockSpec(memory_space=pltpu.MemorySpace.SMEM),   # linear bias
        ],
        out_specs=pl.BlockSpec(memory_space=pltpu.MemorySpace.VMEM),
    )(xcolT, wf, lwt, lb)


def reference(x, p):
    """Pure-JAX reference mirroring the PyTorch forward (eval mode)."""
    xc = jnp.transpose(x, (0, 2, 1))                                  # (B,3,L)
    conv = jax.lax.conv_general_dilated(
        xc, p['wconv'], window_strides=(1,), padding=[(1, 1)],
        dimension_numbers=('NCH', 'OIH', 'NCH'),
        precision=jax.lax.Precision.HIGHEST)
    conv = conv + p['cbias'][None, :, None]
    inv = 1.0 / jnp.sqrt(p['rvar'] + EPS)
    y = ((conv - p['rmean'][None, :, None]) * (p['gamma'] * inv)[None, :, None]
         + p['beta'][None, :, None])
    act = jnp.where(y > 0, y, NEG_SLOPE * y)
    flat = act.reshape(x.shape[0], -1)                                # (B, 25600)
    return jnp.dot(flat, p['lW'].T,
                   precision=jax.lax.Precision.HIGHEST) + p['lb'][None, :]


if __name__ == "__main__":
    key = jax.random.PRNGKey(0)
    ks = jax.random.split(key, 9)
    params = dict(
        wconv=0.1 * jax.random.normal(ks[0], (C_OUT, C_IN, K), jnp.float32),
        cbias=0.1 * jax.random.normal(ks[1], (C_OUT,), jnp.float32),
        gamma=1.0 + 0.1 * jax.random.normal(ks[2], (C_OUT,), jnp.float32),
        beta=0.1 * jax.random.normal(ks[3], (C_OUT,), jnp.float32),
        rmean=0.1 * jax.random.normal(ks[4], (C_OUT,), jnp.float32),
        rvar=1.0 + jnp.abs(jax.random.normal(ks[5], (C_OUT,), jnp.float32)),
        lW=0.01 * jax.random.normal(ks[6], (1, C_OUT * L), jnp.float32),
        lb=0.1 * jax.random.normal(ks[7], (1,), jnp.float32),
    )
    x = jax.random.normal(ks[8], (B, L, C_IN), jnp.float32)

    out = jax.block_until_ready(cnn_forward(x, params))
    ref = jax.block_until_ready(reference(x, params))

    assert out.shape == (B, 1), out.shape
    if not jnp.allclose(out, ref, rtol=2e-3, atol=2e-3):
        raise AssertionError(f"mismatch: pallas={out} ref={ref}")
    print("KERNEL_OK")
</pallas_src>

<mosaic_0001>
module attributes {stable_mosaic.version = 11 : i64} {
  func.func @cnn_kernel(%arg0: memref<2x10x400xf32, #tpu.memory_space<vmem>>, %arg1: memref<64x10xf32, #tpu.memory_space<vmem>>, %arg2: memref<64x400xf32, #tpu.memory_space<vmem>>, %arg3: memref<1x1xf32, #tpu.memory_space<smem>>, %arg4: memref<2x1xf32, #tpu.memory_space<vmem>>) attributes {dimension_semantics = [], scalar_prefetch = 0 : i64, scratch_operands = 0 : i64, tpu.core_type = #tpu.core_type<tc>} {
    %c0 = arith.constant 0 : index
    %c0_0 = arith.constant 0 : index
    %0 = vector.load %arg1[%c0, %c0_0] : memref<64x10xf32, #tpu.memory_space<vmem>>, vector<64x10xf32>
    %c0_1 = arith.constant 0 : index
    %c0_2 = arith.constant 0 : index
    %1 = vector.load %arg2[%c0_1, %c0_2] : memref<64x400xf32, #tpu.memory_space<vmem>>, vector<64x400xf32>
    %c0_3 = arith.constant 0 : index
    %c0_4 = arith.constant 0 : index
    %c0_5 = arith.constant 0 : index
    %2 = vector.load %arg0[%c0_3, %c0_4, %c0_5] : memref<2x10x400xf32, #tpu.memory_space<vmem>>, vector<1x10x400xf32>
    %3 = vector.shape_cast %2 : vector<1x10x400xf32> to vector<10x400xf32>
    %cst = arith.constant dense<0.000000e+00> : vector<64x400xf32>
    %4 = tpu.matmul %0, %3, %cst {dimension_numbers = #tpu.dot_dimension_numbers<[1], [0], [0], [1], [0, 0, 1, 1], [], []>, precision = #tpu.contract_precision<fp32>} : vector<64x10xf32>, vector<10x400xf32>, vector<64x400xf32> -> vector<64x400xf32>
    %cst_6 = arith.constant 0.000000e+00 : f32
    %5 = vector.broadcast %cst_6 : f32 to vector<64x400xf32>
    %6 = arith.cmpf ogt, %4, %5 : vector<64x400xf32>
    %cst_7 = arith.constant 0.00999999977 : f32
    %7 = vector.broadcast %cst_7 : f32 to vector<64x400xf32>
    %8 = arith.mulf %7, %4 : vector<64x400xf32>
    %9 = arith.select %6, %4, %8 : vector<64x400xi1>, vector<64x400xf32>
    %10 = arith.mulf %9, %1 : vector<64x400xf32>
    %cst_8 = arith.constant dense<0.000000e+00> : vector<400xf32>
    %11 = vector.multi_reduction <add>, %10, %cst_8 [0] : vector<64x400xf32> to vector<400xf32>
    %12 = vector.shape_cast %11 : vector<400xf32> to vector<1x400xf32>
    %c1 = arith.constant 1 : index
    %c0_9 = arith.constant 0 : index
    %c0_10 = arith.constant 0 : index
    %13 = vector.load %arg0[%c1, %c0_9, %c0_10] : memref<2x10x400xf32, #tpu.memory_space<vmem>>, vector<1x10x400xf32>
    %14 = vector.shape_cast %13 : vector<1x10x400xf32> to vector<10x400xf32>
    %cst_11 = arith.constant dense<0.000000e+00> : vector<64x400xf32>
    %15 = tpu.matmul %0, %14, %cst_11 {dimension_numbers = #tpu.dot_dimension_numbers<[1], [0], [0], [1], [0, 0, 1, 1], [], []>, precision = #tpu.contract_precision<fp32>} : vector<64x10xf32>, vector<10x400xf32>, vector<64x400xf32> -> vector<64x400xf32>
    %cst_12 = arith.constant 0.000000e+00 : f32
    %16 = vector.broadcast %cst_12 : f32 to vector<64x400xf32>
    %17 = arith.cmpf ogt, %15, %16 : vector<64x400xf32>
    %cst_13 = arith.constant 0.00999999977 : f32
    %18 = vector.broadcast %cst_13 : f32 to vector<64x400xf32>
    %19 = arith.mulf %18, %15 : vector<64x400xf32>
    %20 = arith.select %17, %15, %19 : vector<64x400xi1>, vector<64x400xf32>
    %21 = arith.mulf %20, %1 : vector<64x400xf32>
    %cst_14 = arith.constant dense<0.000000e+00> : vector<400xf32>
    %22 = vector.multi_reduction <add>, %21, %cst_14 [0] : vector<64x400xf32> to vector<400xf32>
    %23 = vector.shape_cast %22 : vector<400xf32> to vector<1x400xf32>
    %24 = tpu.concatenate %12, %23 in 0 : vector<1x400xf32>, vector<1x400xf32> -> vector<2x400xf32>
    %cst_15 = arith.constant dense<0.000000e+00> : vector<2xf32>
    %25 = vector.multi_reduction <add>, %24, %cst_15 [1] : vector<2x400xf32> to vector<2xf32>
    %26 = vector.shape_cast %25 : vector<2xf32> to vector<2x1xf32>
    %c0_16 = arith.constant 0 : index
    %c0_17 = arith.constant 0 : index
    %27 = memref.load %arg3[%c0_16, %c0_17] : memref<1x1xf32, #tpu.memory_space<smem>>
    %28 = vector.broadcast %27 : f32 to vector<2x1xf32>
    %29 = arith.addf %26, %28 : vector<2x1xf32>
    %c0_18 = arith.constant 0 : index
    %c0_19 = arith.constant 0 : index
    %30 = vector.load %arg4[%c0_18, %c0_19] : memref<2x1xf32, #tpu.memory_space<vmem>>, vector<2x1xf32>
    tpu.vector_store %arg4[%c0_18, %c0_19], %29 {strides = array<i32>} : memref<2x1xf32, #tpu.memory_space<vmem>>, vector<2x1xf32>,
    return
  }
}

</mosaic_0001>

<bundles_post_ra>
// kernel: tpu_custom_call.1
= control target key start
LH: loop header
LB: loop body
LE: loop exit
PB: predicated region body
PF: predicated region fallthrough
CT: control target
= control target key end

     0   :  { %10 = vsyncpa [#allocation4], 0  ;;  %s3620_s18 = smov [#allocation3]   ;;  %s3621_s20 = smov 512   ;;  %s4522_s0 = inlined_call_operand.vmem [shape: f32[2,10,400], index: 0, kind: input, shape index: {}]   ;;  %s4523_s1 = inlined_call_operand.vmem [shape: f32[64,10], index: 1, kind: input, shape index: {}]   ;;  %s4524_s2 = inlined_call_operand.hbm [shape: f32[64,400], index: 2, kind: input, shape index: {}]   ;;  %s4525_s3 = inlined_call_operand.<no memory space> [shape: f32[1,1], index: 3, kind: input, shape index: {}]   ;;  %s4526_s4 = inlined_call_operand.vmem [shape: f32[2,1], index: 4, kind: output, shape index: {}]  }
   0x1   :  { %s19_s17 = sshll.u32 %s4524_s2, 4  ;;  %s21_s19 = sshll.u32 %s3620_s18, 4  ;;  %s20_s17 = int_to_ptr.hbm [resolvable:$true] %s19_s17  ;;  %s22_s19 = int_to_ptr.vmem [resolvable:$true] %s21_s19 }
   0x2   :  { %s3622_s21 = smov 32  }
   0x3   :  { %27 = dma.hbm_to_vmem [thread:$0]  %s20_s17, 4096, %s22_s19, [#allocation4], %s3621_s20, %s3621_s20, %s3622_s21  }
   0x4   :  { %3618 = dma.done.wait [#allocation4], 4096  }
   0x5   :  { %3619 = vsyncadd [#allocation4], 4294963200  ;;  %vm107_vm0 = vcmask 1041408   ;;  %vm82_vm1 = vcmask 80896   ;;  %v78_v0 = vld [vmem:[%s4522_s0 + $0x20] sm:$0x3] }
   0x6   :  { %v74_v1 = vld [vmem:[%s4522_s0] sm:$0xff]  ;;  %v109_v3 = vsel %vm107_vm0, %v78_v0, 0  ;;  %v79_v6 = vld [vmem:[%s4522_s0 + $0x28] sm:$0x3]  ;;  %v36_v12 = vld [vmem:[%s4523_s1 + $0x10] sm:$0xff] }
   0x7   :  { %v34_v2 = vld [vmem:[%s4523_s1] sm:$0xff]  ;;  %v3661_v4 = vand.u32 4294901760, %v74_v1  ;;  %v35_v7 = vld [vmem:[%s4523_s1 + $0x8] sm:$0xff]  ;;  %v134_v8 = vand.u32 4294901760, %v109_v3  ;;  %v112_v10 = vsel %vm107_vm0, %v79_v6, 0  ;;  %v90_v21 = vsel %vm82_vm1, %v36_v12, 0 }
   0x8   :  { %v84_v5 = vsel %vm82_vm1, %v34_v2, 0  ;;  %v87_v11 = vsel %vm82_vm1, %v35_v7, 0  ;;  %v3678_v14 = vand.u32 4294901760, %v112_v10  ;;  %v3701_v29 = vand.u32 4294901760, %v90_v21  ;;  %v75_v31 = vld [vmem:[%s4522_s0 + $0x8] sm:$0xff]  ;;  %v37_v35 = vld [vmem:[%s4523_s1 + $0x18] sm:$0xff] }
   0x9   :  { %v3670_v9 = vand.u32 4294901760, %v84_v5  ;;  %v224_v13 = vsub.f32 %v74_v1, %v3661_v4  ;;  %v3680_v15 = vand.u32 4294901760, %v87_v11  ;;  %v218_v16 = vsub.f32 %v109_v3, %v134_v8  ;;  %338 = vmatpush.msra.mxu3 %v134_v8  ;;  %135 = vmatpush.msra.mxu0 %v134_v8  ;;  %v38_v47 = vld [vmem:[%s4523_s1 + $0x20] sm:$0xff]  ;;  %v39_v55 = vld [vmem:[%s4523_s1 + $0x28] sm:$0xff]  ;;  %v40_v62 = vld [vmem:[%s4523_s1 + $0x30] sm:$0xff] }
   0xa   :  { %v594_v18 = vsub.f32 %v112_v10, %v3678_v14  ;;  %v512_v37 = vand.u32 4294901760, %v75_v31  ;;  %v3717_v39 = vsub.f32 %v90_v21, %v3701_v29  ;;  %v93_v40 = vsel %vm82_vm1, %v37_v35, 0 }
   0xb   :  { %v3683_v17 = vsub.f32 %v84_v5, %v3670_v9  ;;  %v225_v19 = vand.u32 4294901760, %v224_v13  ;;  %v3687_v20 = vsub.f32 %v87_v11, %v3680_v15  ;;  %278 = vmatpush.msra.mxu2 %v218_v16  ;;  %340 = vmatpush.msra.mxu3 %v3661_v4  ;;  %v219_v23 = vand.u32 4294901760, %v218_v16  ;;  %v41_v5 = vld [vmem:[%s4523_s1 + $0x38] sm:$0xff] }
   0xc   :  { %137 = vmatpush.msra.mxu0 %v3661_v4  ;;  %v595_v24 = vand.u32 4294901760, %v594_v18  ;;  %v600_v41 = vsub.f32 %v75_v31, %v512_v37  ;;  %v3725_v44 = vand.u32 4294901760, %v3717_v39  ;;  %v3727_v45 = vand.u32 4294901760, %v93_v40 }
   0xd   :  { %v3692_v22 = vand.u32 4294901760, %v3683_v17  ;;  %v226_v25 = vsub.f32 %v224_v13, %v225_v19  ;;  %281 = vmatpush.msra.mxu2 %v224_v13  ;;  %v220_v27 = vsub.f32 %v218_v16, %v219_v23  ;;  %v3699_v28 = vand.u32 4294901760, %v3687_v20 }
   0xe   :  { %284 = vmatmul.f32.vlgmr.msra.gmra.mxu2 %v3683_v17  ;;  %407 = vmatpush.msrb.mxu0 %v219_v23  ;;  %v596_v30 = vsub.f32 %v594_v18, %v595_v24  ;;  %v601_v42 = vand.u32 4294901760, %v600_v41  ;;  %v157_v49 = vsub.f32 %v3717_v39, %v3725_v44  ;;  %v3739_v50 = vsub.f32 %v93_v40, %v3727_v45  ;;  %v80_v23 = vld [vmem:[%s4522_s0 + $0x30] sm:$0x3] }
   0xf   :  { %344 = vmatmul.f32.vlgmr.msra.gmra.mxu3 %v3692_v22  ;;  %v141_v26 = vsub.f32 %v3683_v17, %v3692_v22  ;;  %511 = vmatpush.msrb.mxu2 %v3678_v14  ;;  %v221_v33 = vand.u32 4294901760, %v220_v27  ;;  %v227_v34 = vand.u32 4294901760, %v226_v25  ;;  %v149_v38 = vsub.f32 %v3687_v20, %v3699_v28 }
  0x10   :  { %v597_v36 = vand.u32 4294901760, %v596_v30  ;;  %411 = vmatpush.msrb.mxu0 %v225_v19  ;;  %v602_v46 = vsub.f32 %v600_v41, %v601_v42  ;;  %v96_v51 = vsel %vm82_vm1, %v38_v47, 0  ;;  %v3745_v52 = vand.u32 4294901760, %v157_v49 }
  0x11   :  { %v3708_v32 = vand.u32 4294901760, %v141_v26  ;;  %222 = vmatpush.msra.mxu1 %v221_v33  ;;  %513 = vmatpush.msrb.mxu2 %v512_v37  ;;  %v3722_v43 = vand.u32 4294901760, %v149_v38  ;;  %v3748_v53 = vand.u32 4294901760, %v3739_v50  ;;  %v3750_v54 = vand.u32 4294901760, %v96_v51 }
  0x12   :  { %598 = vmatpush.msrb.mxu3 %v597_v36  ;;  %v603_v48 = vand.u32 4294901760, %v602_v46  ;;  %v99_v58 = vsel %vm82_vm1, %v39_v55, 0  ;;  %v102_v1 = vsel %vm82_vm1, %v40_v62, 0 }
  0x13   :  { %143 = vmatmul.f32.vlgmr.msra.gmra.mxu0 %v3708_v32  ;;  %228 = vmatpush.msra.mxu1 %v227_v34  ;;  %v165_v56 = vsub.f32 %v3739_v50, %v3748_v53  ;;  %v3760_v57 = vsub.f32 %v96_v51, %v3750_v54  ;;  %v3770_v61 = vand.u32 4294901760, %v99_v58  ;;  %v76_v34 = vld [vmem:[%s4522_s0 + $0x10] sm:$0xff] }
  0x14   :  { %783 = vmatpush.msra.mxu2 %v595_v24  ;;  %230 = vmatmul.f32.vlgmr.msra.gmra.mxu1 %v3670_v9  ;;  %v115_v24 = vsel %vm107_vm0, %v80_v23, 0  ;;  %v888_v35 = vand.u32 4294901760, %v76_v34 }
  0x15   :  { %654 = vmatpush.msra.mxu0 %v594_v18  ;;  %460 = vmatpush.msrb.mxu1 %v134_v8  ;;  %v3765_v59 = vand.u32 4294901760, %v165_v56  ;;  %v3768_v60 = vand.u32 4294901760, %v3760_v57  ;;  %v3780_v0 = vsub.f32 %v99_v58, %v3770_v61  ;;  %v105_v8 = vsel %vm82_vm1, %v41_v5, 0 }
  0x16   :  { %289 = vmatmul.f32.gmra.mxu2 %v3687_v20  ;;  %604 = vmatpush.msrb.mxu3 %v603_v48  ;;  %v3810_v12 = vand.u32 4294901760, %v105_v8  ;;  %v886_v25 = vand.u32 4294901760, %v115_v24  ;;  %v976_v40 = vsub.f32 %v76_v34, %v888_v35 }
  0x17   :  { %350 = vmatmul.f32.gmra.mxu3 %v3699_v28  ;;  %657 = vmatpush.msra.mxu0 %v600_v41  ;;  %v173_v63 = vsub.f32 %v3760_v57, %v3768_v60  ;;  %v3788_v3 = vand.u32 4294901760, %v3780_v0 }
  0x18   :  { %462 = vmatpush.msrb.mxu1 %v3661_v4  ;;  %787 = vmatpush.msra.mxu2 %v601_v42  ;;  %v3790_v4 = vand.u32 4294901760, %v102_v1  ;;  %v970_v26 = vsub.f32 %v115_v24, %v886_v25  ;;  %v977_v48 = vand.u32 4294901760, %v976_v40 }
  0x19   :  { %836 = vmatpush.msra.mxu3 %v3678_v14  ;;  %v3785_v2 = vand.u32 4294901760, %v173_v63  ;;  %v181_v6 = vsub.f32 %v3780_v0, %v3788_v3 }
  0x1a   :  { %714 = vmatpush.msra.mxu1 %v3678_v14  ;;  %v3800_v7 = vsub.f32 %v102_v1, %v3790_v4  ;;  %v3817_v14 = vsub.f32 %v105_v8, %v3810_v12  ;;  %v971_v27 = vand.u32 4294901760, %v970_v26  ;;  %v978_v51 = vsub.f32 %v976_v40, %v977_v48 }
  0x1b   :  { %151 = vmatmul.f32.gmra.mxu0 %v3722_v43  ;;  %838 = vmatpush.msra.mxu3 %v512_v37  ;;  %v3805_v10 = vand.u32 4294901760, %v181_v6 }
  0x1c   :  { %716 = vmatpush.msra.mxu1 %v512_v37  ;;  %v3808_v11 = vand.u32 4294901760, %v3800_v7  ;;  %v3824_v18 = vand.u32 4294901760, %v3817_v14  ;;  %v972_v30 = vsub.f32 %v970_v26, %v971_v27  ;;  %v979_v62 = vand.u32 4294901760, %v978_v51 }
  0x1d   :  { %234 = vmatmul.f32.gmra.mxu1 %v3680_v15 }
  0x1e   :  { %294 = vmatmul.f32.gmra.mxu2 %v3717_v39  ;;  %v189_v13 = vsub.f32 %v3800_v7, %v3808_v11  ;;  %v197_v19 = vsub.f32 %v3817_v14, %v3824_v18  ;;  %v973_v31 = vand.u32 4294901760, %v972_v30 }
  0x1f   :  { %356 = vmatmul.f32.gmra.mxu3 %v3725_v44 }
  0x20   :  { %v3821_v16 = vand.u32 4294901760, %v189_v13  ;;  %v3832_v21 = vand.u32 4294901760, %v197_v19 }
  0x23   :  { %159 = vmatmul.f32.gmra.mxu0 %v3745_v52 }
  0x25   :  { %238 = vmatmul.f32.gmra.mxu1 %v3701_v29 }
  0x26   :  { %299 = vmatmul.f32.gmra.mxu2 %v3739_v50 }
  0x27   :  { %362 = vmatmul.f32.gmra.mxu3 %v3748_v53 }
  0x2b   :  { %167 = vmatmul.f32.gmra.mxu0 %v3765_v59 }
  0x2d   :  { %242 = vmatmul.f32.gmra.mxu1 %v3727_v45 }
  0x2e   :  { %304 = vmatmul.f32.gmra.mxu2 %v3760_v57 }
  0x2f   :  { %368 = vmatmul.f32.gmra.mxu3 %v3768_v60 }
  0x33   :  { %175 = vmatmul.f32.gmra.mxu0 %v3785_v2 }
  0x35   :  { %246 = vmatmul.f32.gmra.mxu1 %v3750_v54 }
  0x36   :  { %309 = vmatmul.f32.gmra.mxu2 %v3780_v0 }
  0x37   :  { %374 = vmatmul.f32.gmra.mxu3 %v3788_v3 }
  0x3b   :  { %183 = vmatmul.f32.gmra.mxu0 %v3805_v10 }
  0x3d   :  { %250 = vmatmul.f32.gmra.mxu1 %v3770_v61 }
  0x3e   :  { %314 = vmatmul.f32.gmra.mxu2 %v3800_v7 }
  0x3f   :  { %380 = vmatmul.f32.gmra.mxu3 %v3808_v11 }
  0x43   :  { %191 = vmatmul.f32.gmra.mxu0 %v3821_v16 }
  0x45   :  { %254 = vmatmul.f32.gmra.mxu1 %v3790_v4 }
  0x46   :  { %319 = vmatmul.f32.gmra.mxu2 %v3817_v14 }
  0x47   :  { %386 = vmatmul.f32.gmra.mxu3 %v3824_v18 }
  0x4b   :  { %199 = vmatmul.f32.gmra.mxu0 %v3832_v21 }
  0x4d   :  { %258 = vmatmul.f32.gmra.mxu1 %v3810_v12 }
  0x4e   :  { %519 = vmatmul.f32.vlgmr.msrb.gmra.mxu2 %v3708_v32 }
  0x4f   :  { %606 = vmatmul.f32.vlgmr.msrb.gmra.mxu3 %v3670_v9  ;;  %1030 = vmatpush.msrb.mxu2 %v970_v26 }
  0x50   :  { %1090 = vmatpush.msrb.mxu3 %v886_v25 }
  0x51   :  { %1033 = vmatpush.msrb.mxu2 %v976_v40 }
  0x52   :  { %1092 = vmatpush.msrb.mxu3 %v888_v35 }
  0x53   :  { %413 = vmatmul.f32.vlgmr.msrb.gmra.mxu0 %v3670_v9 }
  0x54   :  { %887 = vmatpush.msrb.mxu0 %v886_v25 }
  0x55   :  { %464 = vmatmul.f32.vlgmr.msrb.gmra.mxu1 %v3670_v9 }
  0x56   :  { %527 = vmatmul.f32.gmra.mxu2 %v3722_v43  ;;  %974 = vmatpush.msrb.mxu1 %v973_v31 }
  0x57   :  { %610 = vmatmul.f32.gmra.mxu3 %v3680_v15  ;;  %889 = vmatpush.msrb.mxu0 %v888_v35 }
  0x58   :  { %980 = vmatpush.msrb.mxu1 %v979_v62 }
  0x5b   :  { %417 = vmatmul.f32.gmra.mxu0 %v3680_v15 }
  0x5d   :  { %468 = vmatmul.f32.gmra.mxu1 %v3680_v15 }
  0x5e   :  { %535 = vmatmul.f32.gmra.mxu2 %v3745_v52 }
  0x5f   :  { %614 = vmatmul.f32.gmra.mxu3 %v3701_v29 }
  0x63   :  { %421 = vmatmul.f32.gmra.mxu0 %v3701_v29 }
  0x65   :  { %472 = vmatmul.f32.gmra.mxu1 %v3701_v29 }
  0x66   :  { %543 = vmatmul.f32.gmra.mxu2 %v3765_v59 }
  0x67   :  { %618 = vmatmul.f32.gmra.mxu3 %v3727_v45 }
  0x6b   :  { %425 = vmatmul.f32.gmra.mxu0 %v3727_v45 }
  0x6d   :  { %476 = vmatmul.f32.gmra.mxu1 %v3727_v45 }
  0x6e   :  { %551 = vmatmul.f32.gmra.mxu2 %v3785_v2 }
  0x6f   :  { %622 = vmatmul.f32.gmra.mxu3 %v3750_v54 }
  0x73   :  { %429 = vmatmul.f32.gmra.mxu0 %v3750_v54 }
  0x75   :  { %480 = vmatmul.f32.gmra.mxu1 %v3750_v54 }
  0x76   :  { %559 = vmatmul.f32.gmra.mxu2 %v3805_v10 }
  0x77   :  { %626 = vmatmul.f32.gmra.mxu3 %v3770_v61 }
  0x7b   :  { %433 = vmatmul.f32.gmra.mxu0 %v3770_v61 }
  0x7d   :  { %484 = vmatmul.f32.gmra.mxu1 %v3770_v61 }
  0x7e   :  { %567 = vmatmul.f32.gmra.mxu2 %v3821_v16 }
  0x7f   :  { %630 = vmatmul.f32.gmra.mxu3 %v3790_v4 }
  0x83   :  { %437 = vmatmul.f32.gmra.mxu0 %v3790_v4 }
  0x85   :  { %488 = vmatmul.f32.gmra.mxu1 %v3790_v4 }
  0x86   :  { %575 = vmatmul.f32.gmra.mxu2 %v3832_v21 }
  0x87   :  { %634 = vmatmul.f32.gmra.mxu3 %v3810_v12 }
  0x8b   :  { %441 = vmatmul.f32.gmra.mxu0 %v3810_v12 }
  0x8d   :  { %492 = vmatmul.f32.gmra.mxu1 %v3810_v12 }
  0x8e   :  { %789 = vmatmul.f32.vlgmr.msra.gmra.mxu2 %v3670_v9 }
  0x8f   :  { %840 = vmatmul.f32.vlgmr.msra.gmra.mxu3 %v3670_v9 }
  0x90   :  { %v144_v33 = vpop.f32.mrf.mxu0 }
  0x91   :  { %v231_v37 = vpop.f32.mrf.mxu1  ;;  %v285_v38 = vpop.f32.mrf.mxu2 }
  0x92   :  { %v345_v36 = vpop.f32.mrf.mxu3  ;;  %v232_v41 = vadd.f32 %v231_v37, %v144_v33 }
  0x93   :  { %660 = vmatmul.f32.vlgmr.msra.gmra.mxu0 %v3683_v17 }
  0x94   :  { %1159 = vmatpush.msra.mxu0 %v971_v27  ;;  %v286_v42 = vadd.f32 %v285_v38, %v232_v41 }
  0x95   :  { %720 = vmatmul.f32.vlgmr.msra.gmra.mxu1 %v3692_v22 }
  0x96   :  { %v3881_v46 = vadd.f32 %v345_v36, %v286_v42  ;;  %793 = vmatmul.f32.gmra.mxu2 %v3680_v15  ;;  %1163 = vmatpush.msra.mxu0 %v977_v48  ;;  %v81_v36 = vld [vmem:[%s4522_s0 + $0x38] sm:$0x3] }
  0x97   :  { %844 = vmatmul.f32.gmra.mxu3 %v3680_v15  ;;  %1212 = vmatpush.msra.mxu1 %v886_v25  ;;  %v118_v38 = vsel %vm107_vm0, %v81_v36, 0 }
  0x98   :  { %v152_v47 = vpop.f32.mrf.mxu0  ;;  %v3907_v42 = vand.u32 4294901760, %v118_v38 }
  0x99   :  { %v290_v56 = vpop.f32.mrf.mxu2  ;;  %1214 = vmatpush.msra.mxu1 %v888_v35 }
  0x9a   :  { %v351_v49 = vpop.f32.mrf.mxu3  ;;  %v235_v55 = vpop.f32.mrf.mxu1  ;;  %1263 = vmatpush.msra.mxu2 %v3907_v42  ;;  %v1346_v48 = vsub.f32 %v118_v38, %v3907_v42 }
  0x9b   :  { %665 = vmatmul.f32.gmra.mxu0 %v3687_v20  ;;  %v236_v58 = vadd.f32 %v235_v55, %v152_v47 }
  0x9d   :  { %v291_v63 = vadd.f32 %v290_v56, %v236_v58  ;;  %726 = vmatmul.f32.gmra.mxu1 %v3699_v28  ;;  %v1347_v56 = vand.u32 4294901760, %v1346_v48 }
  0x9e   :  { %797 = vmatmul.f32.gmra.mxu2 %v3701_v29 }
  0x9f   :  { %848 = vmatmul.f32.gmra.mxu3 %v3701_v29  ;;  %v3887_v1 = vadd.f32 %v351_v49, %v291_v63 }
  0xa0   :  { %v160_v5 = vpop.f32.mrf.mxu0 }
  0xa1   :  { %v295_v13 = vpop.f32.mrf.mxu2 }
  0xa2   :  { %v357_v6 = vpop.f32.mrf.mxu3  ;;  %v239_v8 = vpop.f32.mrf.mxu1 }
  0xa3   :  { %670 = vmatmul.f32.gmra.mxu0 %v3717_v39  ;;  %v240_v19 = vadd.f32 %v239_v8, %v160_v5  ;;  %v1348_v5 = vsub.f32 %v1346_v48, %v1347_v56 }
  0xa5   :  { %v296_v23 = vadd.f32 %v295_v13, %v240_v19  ;;  %732 = vmatmul.f32.gmra.mxu1 %v3725_v44  ;;  %v1349_v8 = vand.u32 4294901760, %v1348_v5  ;;  %v77_v5 = vld [vmem:[%s4522_s0 + $0x18] sm:$0xff] }
  0xa6   :  { %801 = vmatmul.f32.gmra.mxu2 %v3727_v45 }
  0xa7   :  { %852 = vmatmul.f32.gmra.mxu3 %v3727_v45  ;;  %v3893_v24 = vadd.f32 %v357_v6, %v296_v23 }
  0xa8   :  { %v168_v26 = vpop.f32.mrf.mxu0  ;;  %1350 = vmatpush.msra.mxu3 %v1349_v8  ;;  %v1264_v8 = vand.u32 4294901760, %v77_v5 }
  0xa9   :  { %v300_v25 = vpop.f32.mrf.mxu2 }
  0xaa   :  { %v363_v27 = vpop.f32.mrf.mxu3  ;;  %v243_v30 = vpop.f32.mrf.mxu1  ;;  %1265 = vmatpush.msra.mxu2 %v1264_v8 }
  0xab   :  { %675 = vmatmul.f32.gmra.mxu0 %v3739_v50  ;;  %v244_v31 = vadd.f32 %v243_v30, %v168_v26 }
  0xad   :  { %v301_v33 = vadd.f32 %v300_v25, %v244_v31  ;;  %738 = vmatmul.f32.gmra.mxu1 %v3748_v53 }
  0xae   :  { %805 = vmatmul.f32.gmra.mxu2 %v3750_v54 }
  0xaf   :  { %856 = vmatmul.f32.gmra.mxu3 %v3750_v54  ;;  %v3899_v34 = vadd.f32 %v363_v27, %v301_v33 }
  0xb0   :  { %v176_v35 = vpop.f32.mrf.mxu0 }
  0xb1   :  { %v305_v41 = vpop.f32.mrf.mxu2 }
  0xb2   :  { %v369_v37 = vpop.f32.mrf.mxu3  ;;  %v247_v40 = vpop.f32.mrf.mxu1 }
  0xb3   :  { %680 = vmatmul.f32.gmra.mxu0 %v3760_v57  ;;  %v248_v47 = vadd.f32 %v247_v40, %v176_v35 }
  0xb5   :  { %v306_v49 = vadd.f32 %v305_v41, %v248_v47  ;;  %744 = vmatmul.f32.gmra.mxu1 %v3768_v60 }
  0xb6   :  { %809 = vmatmul.f32.gmra.mxu2 %v3770_v61 }
  0xb7   :  { %860 = vmatmul.f32.gmra.mxu3 %v3770_v61  ;;  %v3913_v51 = vadd.f32 %v369_v37, %v306_v49 }
  0xb8   :  { %v184_v55 = vpop.f32.mrf.mxu0 }
  0xb9   :  { %v310_v63 = vpop.f32.mrf.mxu2 }
  0xba   :  { %v375_v58 = vpop.f32.mrf.mxu3  ;;  %v251_v62 = vpop.f32.mrf.mxu1 }
  0xbb   :  { %685 = vmatmul.f32.gmra.mxu0 %v3780_v0  ;;  %v252_v6 = vadd.f32 %v251_v62, %v184_v55 }
  0xbd   :  { %v311_v13 = vadd.f32 %v310_v63, %v252_v6  ;;  %750 = vmatmul.f32.gmra.mxu1 %v3788_v3 }
  0xbe   :  { %813 = vmatmul.f32.gmra.mxu2 %v3790_v4 }
  0xbf   :  { %864 = vmatmul.f32.gmra.mxu3 %v3790_v4  ;;  %v3919_v19 = vadd.f32 %v375_v58, %v311_v13 }
  0xc0   :  { %v192_v23 = vpop.f32.mrf.mxu0 }
  0xc1   :  { %v315_v30 = vpop.f32.mrf.mxu2 }
  0xc2   :  { %v381_v26 = vpop.f32.mrf.mxu3  ;;  %v255_v27 = vpop.f32.mrf.mxu1 }
  0xc3   :  { %690 = vmatmul.f32.gmra.mxu0 %v3800_v7  ;;  %v256_v25 = vadd.f32 %v255_v27, %v192_v23 }
  0xc5   :  { %v316_v31 = vadd.f32 %v315_v30, %v256_v25  ;;  %756 = vmatmul.f32.gmra.mxu1 %v3808_v11  ;;  %v1352_v25 = vsub.f32 %v77_v5, %v1264_v8 }
  0xc6   :  { %817 = vmatmul.f32.gmra.mxu2 %v3810_v12 }
  0xc7   :  { %868 = vmatmul.f32.gmra.mxu3 %v3810_v12  ;;  %v3925_v33 = vadd.f32 %v381_v26, %v316_v31 }
  0xc8   :  { %v200_v35 = vpop.f32.mrf.mxu0 }
  0xc9   :  { %v320_v38 = vpop.f32.mrf.mxu2 }
  0xca   :  { %v387_v36 = vpop.f32.mrf.mxu3  ;;  %v259_v37 = vpop.f32.mrf.mxu1 }
  0xcb   :  { %695 = vmatmul.f32.gmra.mxu0 %v3817_v14  ;;  %v260_v40 = vadd.f32 %v259_v37, %v200_v35 }
  0xcd   :  { %v321_v41 = vadd.f32 %v320_v38, %v260_v40  ;;  %762 = vmatmul.f32.gmra.mxu1 %v3824_v18  ;;  %v46_v38 = vld [vmem:[#allocation3 + $0x20] sm:$0xff] }
  0xce   :  { %1036 = vmatmul.f32.vlgmr.msrb.gmra.mxu2 %v3683_v17 }
  0xcf   :  { %1096 = vmatmul.f32.vlgmr.msrb.gmra.mxu3 %v3692_v22  ;;  %v3931_v47 = vadd.f32 %v387_v36, %v321_v41  ;;  %1535 = vmatpush.msrb.mxu2 %v1347_v56  ;;  %v1353_v56 = vand.u32 4294901760, %v1352_v25  ;;  %v42_v36 = vld [vmem:[#allocation3] sm:$0xff] }
  0xd0   :  { %v414_v49 = vpop.f32.mrf.mxu0 }
  0xd1   :  { %v415_v55 = vadd.f32 %v414_v49, %v3881_v46  ;;  %v520_v63 = vpop.f32.mrf.mxu2  ;;  %1539 = vmatpush.msrb.mxu2 %v1353_v56 }
  0xd2   :  { %v607_v58 = vpop.f32.mrf.mxu3  ;;  %v465_v62 = vpop.f32.mrf.mxu1 }
  0xd3   :  { %895 = vmatmul.f32.vlgmr.msrb.gmra.mxu0 %v3708_v32  ;;  %v3939_v6 = vadd.f32 %v607_v58, %v520_v63  ;;  %v466_v13 = vadd.f32 %v465_v62, %v415_v55 }
  0xd4   :  { %1406 = vmatpush.msrb.mxu0 %v1346_v48 }
  0xd5   :  { %982 = vmatmul.f32.vlgmr.msrb.gmra.mxu1 %v3670_v9  ;;  %v1656_v26 = vmul.f32 0.01, %v466_v13  ;;  %vm1624_vm2 = vcmp.gt.f32.partialorder %v466_v13, 0.0 }
  0xd6   :  { %1041 = vmatmul.f32.gmra.mxu2 %v3687_v20  ;;  %1466 = vmatpush.msrb.mxu1 %v3907_v42 }
  0xd7   :  { %1102 = vmatmul.f32.gmra.mxu3 %v3699_v28  ;;  %1409 = vmatpush.msrb.mxu0 %v1352_v25  ;;  %v1688_v37 = vsel %vm1624_vm2, %v466_v13, %v1656_v26 }
  0xd8   :  { %v418_v46 = vpop.f32.mrf.mxu0  ;;  %1468 = vmatpush.msrb.mxu1 %v1264_v8  ;;  %v1720_v55 = vmul.f32 %v1688_v37, %v42_v36 }
  0xd9   :  { %v419_v23 = vadd.f32 %v418_v46, %v3887_v1  ;;  %v528_v48 = vpop.f32.mrf.mxu2  ;;  %v1354_v1 = vsub.f32 %v1352_v25, %v1353_v56 }
  0xda   :  { %v611_v27 = vpop.f32.mrf.mxu3  ;;  %v469_v30 = vpop.f32.mrf.mxu1 }
  0xdb   :  { %903 = vmatmul.f32.gmra.mxu0 %v3722_v43  ;;  %v470_v31 = vadd.f32 %v469_v30, %v419_v23  ;;  %v3947_v35 = vadd.f32 %v611_v27, %v528_v48  ;;  %v1355_v63 = vand.u32 4294901760, %v1354_v1  ;;  %v50_v30 = vld [vmem:[#allocation3 + $0x40] sm:$0xff] }
  0xdd   :  { %vm1628_vm3 = vcmp.gt.f32.partialorder %v470_v31, 0.0  ;;  %v1660_v40 = vmul.f32 0.01, %v470_v31  ;;  %986 = vmatmul.f32.gmra.mxu1 %v3680_v15  ;;  %1356 = vmatpush.msra.mxu3 %v1355_v63 }
  0xde   :  { %1046 = vmatmul.f32.gmra.mxu2 %v3717_v39 }
  0xdf   :  { %1108 = vmatmul.f32.gmra.mxu3 %v3725_v44  ;;  %v1692_v41 = vsel %vm1628_vm3, %v470_v31, %v1660_v40 }
  0xe0   :  { %v422_v49 = vpop.f32.mrf.mxu0  ;;  %v1724_v58 = vmul.f32 %v1692_v41, %v46_v38  ;;  %1588 = vmatpush.msrb.mxu3 %v3907_v42  ;;  %v54_v41 = vld [vmem:[#allocation3 + $0x60] sm:$0xff] }
  0xe1   :  { %v423_v62 = vadd.f32 %v422_v49, %v3893_v24  ;;  %v536_v23 = vpop.f32.mrf.mxu2 }
  0xe2   :  { %v615_v5 = vpop.f32.mrf.mxu3  ;;  %v1752_v13 = vadd.f32 %v1724_v58, %v1720_v55  ;;  %v473_v46 = vpop.f32.mrf.mxu1  ;;  %1590 = vmatpush.msrb.mxu3 %v1264_v8 }
  0xe3   :  { %911 = vmatmul.f32.gmra.mxu0 %v3745_v52  ;;  %v474_v26 = vadd.f32 %v473_v46, %v423_v62  ;;  %v3954_v27 = vadd.f32 %v615_v5, %v536_v23 }
  0xe5   :  { %vm1632_vm4 = vcmp.gt.f32.partialorder %v474_v26, 0.0  ;;  %v1664_v48 = vmul.f32 0.01, %v474_v26  ;;  %990 = vmatmul.f32.gmra.mxu1 %v3701_v29 }
  0xe6   :  { %1051 = vmatmul.f32.gmra.mxu2 %v3739_v50 }
  0xe7   :  { %1114 = vmatmul.f32.gmra.mxu3 %v3748_v53  ;;  %v1696_v24 = vsel %vm1632_vm4, %v474_v26, %v1664_v48  ;;  %v58_v26 = vld [vmem:[#allocation3 + $0x80] sm:$0xff] }
  0xe8   :  { %v426_v25 = vpop.f32.mrf.mxu0  ;;  %v1728_v31 = vmul.f32 %v1696_v24, %v50_v30 }
  0xe9   :  { %v427_v56 = vadd.f32 %v426_v25, %v3899_v34  ;;  %v544_v42 = vpop.f32.mrf.mxu2 }
  0xea   :  { %v619_v36 = vpop.f32.mrf.mxu3  ;;  %v1753_v37 = vadd.f32 %v1752_v13, %v1728_v31  ;;  %v477_v38 = vpop.f32.mrf.mxu1 }
  0xeb   :  { %919 = vmatmul.f32.gmra.mxu0 %v3765_v59  ;;  %v478_v40 = vadd.f32 %v477_v38, %v427_v56  ;;  %v3962_v1 = vadd.f32 %v619_v36, %v544_v42 }
  0xed   :  { %vm1636_vm5 = vcmp.gt.f32.partialorder %v478_v40, 0.0  ;;  %v1668_v8 = vmul.f32 0.01, %v478_v40  ;;  %994 = vmatmul.f32.gmra.mxu1 %v3727_v45 }
  0xee   :  { %1056 = vmatmul.f32.gmra.mxu2 %v3760_v57 }
  0xef   :  { %1120 = vmatmul.f32.gmra.mxu3 %v3768_v60  ;;  %v1700_v49 = vsel %vm1636_vm5, %v478_v40, %v1668_v8  ;;  %v62_v40 = vld [vmem:[#allocation3 + $0xa0] sm:$0xff] }
  0xf0   :  { %v430_v55 = vpop.f32.mrf.mxu0  ;;  %v1732_v34 = vmul.f32 %v1700_v49, %v54_v41 }
  0xf1   :  { %v431_v58 = vadd.f32 %v430_v55, %v3913_v51  ;;  %v552_v13 = vpop.f32.mrf.mxu2 }
  0xf2   :  { %v623_v62 = vpop.f32.mrf.mxu3  ;;  %v1754_v63 = vadd.f32 %v1753_v37, %v1732_v34  ;;  %v481_v5 = vpop.f32.mrf.mxu1 }
  0xf3   :  { %927 = vmatmul.f32.gmra.mxu0 %v3785_v2  ;;  %v482_v46 = vadd.f32 %v481_v5, %v431_v58  ;;  %v3969_v23 = vadd.f32 %v623_v62, %v552_v13 }
  0xf5   :  { %vm1640_vm6 = vcmp.gt.f32.partialorder %v482_v46, 0.0  ;;  %v1672_v30 = vmul.f32 0.01, %v482_v46  ;;  %998 = vmatmul.f32.gmra.mxu1 %v3750_v54 }
  0xf6   :  { %1061 = vmatmul.f32.gmra.mxu2 %v3780_v0 }
  0xf7   :  { %1126 = vmatmul.f32.gmra.mxu3 %v3788_v3  ;;  %v1704_v48 = vsel %vm1640_vm6, %v482_v46, %v1672_v30  ;;  %v66_v46 = vld [vmem:[#allocation3 + $0xc0] sm:$0xff] }
  0xf8   :  { %v434_v24 = vpop.f32.mrf.mxu0  ;;  %v1736_v51 = vmul.f32 %v1704_v48, %v58_v26 }
  0xf9   :  { %v435_v25 = vadd.f32 %v434_v24, %v3919_v19  ;;  %v560_v37 = vpop.f32.mrf.mxu2 }
  0xfa   :  { %v627_v31 = vpop.f32.mrf.mxu3  ;;  %v1755_v56 = vadd.f32 %v1754_v63, %v1736_v51  ;;  %v485_v36 = vpop.f32.mrf.mxu1 }
  0xfb   :  { %935 = vmatmul.f32.gmra.mxu0 %v3805_v10  ;;  %v486_v38 = vadd.f32 %v485_v36, %v435_v25  ;;  %v3976_v42 = vadd.f32 %v627_v31, %v560_v37 }
  0xfd   :  { %vm1644_vm7 = vcmp.gt.f32.partialorder %v486_v38, 0.0  ;;  %v1676_v41 = vmul.f32 0.01, %v486_v38  ;;  %1002 = vmatmul.f32.gmra.mxu1 %v3770_v61 }
  0xfe   :  { %1066 = vmatmul.f32.gmra.mxu2 %v3800_v7 }
  0xff   :  { %1132 = vmatmul.f32.gmra.mxu3 %v3808_v11  ;;  %v1708_v8 = vsel %vm1644_vm7, %v486_v38, %v1676_v41  ;;  %v70_v38 = vld [vmem:[#allocation3 + $0xe0] sm:$0xff] }
 0x100   :  { %v438_v49 = vpop.f32.mrf.mxu0  ;;  %v1740_v19 = vmul.f32 %v1708_v8, %v62_v40 }
 0x101   :  { %v439_v55 = vadd.f32 %v438_v49, %v3925_v33  ;;  %v568_v63 = vpop.f32.mrf.mxu2 }
 0x102   :  { %v631_v34 = vpop.f32.mrf.mxu3  ;;  %v1756_v58 = vadd.f32 %v1755_v56, %v1740_v19  ;;  %v489_v62 = vpop.f32.mrf.mxu1 }
 0x103   :  { %943 = vmatmul.f32.gmra.mxu0 %v3821_v16  ;;  %v490_v5 = vadd.f32 %v489_v62, %v439_v55  ;;  %v3983_v13 = vadd.f32 %v631_v34, %v568_v63 }
 0x105   :  { %vm1648_vm8 = vcmp.gt.f32.partialorder %v490_v5, 0.0  ;;  %v1680_v26 = vmul.f32 0.01, %v490_v5  ;;  %1006 = vmatmul.f32.gmra.mxu1 %v3790_v4 }
 0x106   :  { %1071 = vmatmul.f32.gmra.mxu2 %v3817_v14 }
 0x107   :  { %1138 = vmatmul.f32.gmra.mxu3 %v3824_v18  ;;  %v1712_v30 = vsel %vm1648_vm8, %v490_v5, %v1680_v26 }
 0x108   :  { %v442_v48 = vpop.f32.mrf.mxu0  ;;  %v1744_v33 = vmul.f32 %v1712_v30, %v66_v46 }
 0x109   :  { %v443_v24 = vadd.f32 %v442_v48, %v3931_v47  ;;  %v576_v56 = vpop.f32.mrf.mxu2 }
 0x10a   :  { %v635_v51 = vpop.f32.mrf.mxu3  ;;  %v1757_v25 = vadd.f32 %v1756_v58, %v1744_v33  ;;  %v493_v31 = vpop.f32.mrf.mxu1 }
 0x10b   :  { %951 = vmatmul.f32.gmra.mxu0 %v3832_v21  ;;  %v494_v36 = vadd.f32 %v493_v31, %v443_v24  ;;  %v3990_v37 = vadd.f32 %v635_v51, %v576_v56 }
 0x10d   :  { %vm1652_vm9 = vcmp.gt.f32.partialorder %v494_v36, 0.0  ;;  %v1684_v40 = vmul.f32 0.01, %v494_v36  ;;  %1010 = vmatmul.f32.gmra.mxu1 %v3810_v12 }
 0x10e   :  { %1271 = vmatmul.f32.vlgmr.msra.gmra.mxu2 %v3708_v32 }
 0x10f   :  { %1358 = vmatmul.f32.vlgmr.msra.gmra.mxu3 %v3670_v9  ;;  %v1716_v41 = vsel %vm1652_vm9, %v494_v36, %v1684_v40 }
 0x110   :  { %v661_v8 = vpop.f32.mrf.mxu0  ;;  %v1748_v47 = vmul.f32 %v1716_v41, %v70_v38  ;;  %v47_v38 = vld [vmem:[#allocation3 + $0x28] sm:$0xff] }
 0x111   :  { %v662_v49 = vadd.f32 %v661_v8, %v3939_v6  ;;  %v790_v58 = vpop.f32.mrf.mxu2 }
 0x112   :  { %v841_v19 = vpop.f32.mrf.mxu3  ;;  %v3996_v55 = vadd.f32 %v1757_v25, %v1748_v47  ;;  %v721_v34 = vpop.f32.mrf.mxu1 }
 0x113   :  { %1165 = vmatmul.f32.vlgmr.msra.gmra.mxu0 %v3670_v9  ;;  %v722_v62 = vadd.f32 %v721_v34, %v662_v49 }
 0x115   :  { %v791_v63 = vadd.f32 %v790_v58, %v722_v62  ;;  %1216 = vmatmul.f32.vlgmr.msra.gmra.mxu1 %v3670_v9 }
 0x116   :  { %1279 = vmatmul.f32.gmra.mxu2 %v3722_v43 }
 0x117   :  { %1362 = vmatmul.f32.gmra.mxu3 %v3680_v15  ;;  %v842_v5 = vadd.f32 %v841_v19, %v791_v63 }
 0x118   :  { %v666_v46 = vpop.f32.mrf.mxu0 }
 0x119   :  { %v667_v26 = vadd.f32 %v666_v46, %v3947_v35  ;;  %v794_v48 = vpop.f32.mrf.mxu2  ;;  %v1657_v24 = vmul.f32 0.01, %v842_v5  ;;  %vm1625_vm10 = vcmp.gt.f32.partialorder %v842_v5, 0.0  ;;  %v43_v35 = vld [vmem:[#allocation3 + $0x8] sm:$0xff] }
 0x11a   :  { %v845_v6 = vpop.f32.mrf.mxu3  ;;  %v727_v30 = vpop.f32.mrf.mxu1 }
 0x11b   :  { %1169 = vmatmul.f32.gmra.mxu0 %v3680_v15  ;;  %v728_v33 = vadd.f32 %v727_v30, %v667_v26  ;;  %v1689_v36 = vsel %vm1625_vm10, %v842_v5, %v1657_v24  ;;  %v51_v26 = vld [vmem:[#allocation3 + $0x48] sm:$0xff] }
 0x11c   :  { %v1721_v34 = vmul.f32 %v1689_v36, %v43_v35 }
 0x11d   :  { %v795_v51 = vadd.f32 %v794_v48, %v728_v33  ;;  %1220 = vmatmul.f32.gmra.mxu1 %v3680_v15 }
 0x11e   :  { %1287 = vmatmul.f32.gmra.mxu2 %v3745_v52 }
 0x11f   :  { %1366 = vmatmul.f32.gmra.mxu3 %v3701_v29  ;;  %v846_v25 = vadd.f32 %v845_v6, %v795_v51 }
 0x120   :  { %v671_v31 = vpop.f32.mrf.mxu0 }
 0x121   :  { %v672_v56 = vadd.f32 %v671_v31, %v3954_v27  ;;  %vm1629_vm11 = vcmp.gt.f32.partialorder %v846_v25, 0.0  ;;  %v1661_v40 = vmul.f32 0.01, %v846_v25  ;;  %v798_v47 = vpop.f32.mrf.mxu2 }
 0x122   :  { %v849_v41 = vpop.f32.mrf.mxu3  ;;  %v733_v8 = vpop.f32.mrf.mxu1 }
 0x123   :  { %1173 = vmatmul.f32.gmra.mxu0 %v3701_v29  ;;  %v1693_v49 = vsel %vm1629_vm11, %v846_v25, %v1661_v40  ;;  %v734_v19 = vadd.f32 %v733_v8, %v672_v56 }
 0x124   :  { %v1725_v58 = vmul.f32 %v1693_v49, %v47_v38  ;;  %v55_v38 = vld [vmem:[#allocation3 + $0x68] sm:$0xff] }
 0x125   :  { %v799_v62 = vadd.f32 %v798_v47, %v734_v19  ;;  %1224 = vmatmul.f32.gmra.mxu1 %v3701_v29 }
 0x126   :  { %v1765_v63 = vadd.f32 %v1725_v58, %v1721_v34  ;;  %1295 = vmatmul.f32.gmra.mxu2 %v3765_v59 }
 0x127   :  { %1370 = vmatmul.f32.gmra.mxu3 %v3727_v45  ;;  %v850_v27 = vadd.f32 %v849_v41, %v799_v62 }
 0x128   :  { %v676_v5 = vpop.f32.mrf.mxu0 }
 0x129   :  { %v677_v46 = vadd.f32 %v676_v5, %v3962_v1  ;;  %vm1633_vm12 = vcmp.gt.f32.partialorder %v850_v27, 0.0  ;;  %v1665_v6 = vmul.f32 0.01, %v850_v27  ;;  %v802_v33 = vpop.f32.mrf.mxu2  ;;  %v59_v5 = vld [vmem:[#allocation3 + $0x88] sm:$0xff] }
 0x12a   :  { %v853_v30 = vpop.f32.mrf.mxu3  ;;  %v739_v48 = vpop.f32.mrf.mxu1 }
 0x12b   :  { %1177 = vmatmul.f32.gmra.mxu0 %v3727_v45  ;;  %v1697_v24 = vsel %vm1633_vm12, %v850_v27, %v1665_v6  ;;  %v740_v51 = vadd.f32 %v739_v48, %v677_v46 }
 0x12c   :  { %v1729_v25 = vmul.f32 %v1697_v24, %v51_v26 }
 0x12d   :  { %v803_v31 = vadd.f32 %v802_v33, %v740_v51  ;;  %1228 = vmatmul.f32.gmra.mxu1 %v3727_v45  ;;  %v3555_v51 = vld [vmem:[%s4522_s0 + $0x60] sm:$0x3] }
 0x12e   :  { %v1766_v56 = vadd.f32 %v1765_v63, %v1729_v25  ;;  %1303 = vmatmul.f32.gmra.mxu2 %v3785_v2 }
 0x12f   :  { %1374 = vmatmul.f32.gmra.mxu3 %v3750_v54  ;;  %v854_v35 = vadd.f32 %v853_v30, %v803_v31 }
 0x130   :  { %v681_v36 = vpop.f32.mrf.mxu0 }
 0x131   :  { %v682_v1 = vadd.f32 %v681_v36, %v3969_v23  ;;  %vm1637_vm13 = vcmp.gt.f32.partialorder %v854_v35, 0.0  ;;  %v1669_v40 = vmul.f32 0.01, %v854_v35  ;;  %v806_v47 = vpop.f32.mrf.mxu2 }
 0x132   :  { %v857_v41 = vpop.f32.mrf.mxu3  ;;  %v745_v8 = vpop.f32.mrf.mxu1 }
 0x133   :  { %1181 = vmatmul.f32.gmra.mxu0 %v3750_v54  ;;  %v1701_v49 = vsel %vm1637_vm13, %v854_v35, %v1669_v40  ;;  %v746_v19 = vadd.f32 %v745_v8, %v682_v1  ;;  %v63_v40 = vld [vmem:[#allocation3 + $0xa8] sm:$0xff]  ;;  %vm1791_vm13 = vcmask 130048  }
 0x134   :  { %v1733_v34 = vmul.f32 %v1701_v49, %v55_v38 }
 0x135   :  { %v807_v58 = vadd.f32 %v806_v47, %v746_v19  ;;  %1232 = vmatmul.f32.gmra.mxu1 %v3750_v54 }
 0x136   :  { %v1767_v62 = vadd.f32 %v1766_v56, %v1733_v34  ;;  %1311 = vmatmul.f32.gmra.mxu2 %v3805_v10 }
 0x137   :  { %1378 = vmatmul.f32.gmra.mxu3 %v3770_v61  ;;  %v858_v63 = vadd.f32 %v857_v41, %v807_v58 }
 0x138   :  { %v686_v27 = vpop.f32.mrf.mxu0 }
 0x139   :  { %v687_v23 = vadd.f32 %v686_v27, %v3976_v42  ;;  %vm1641_vm14 = vcmp.gt.f32.partialorder %v858_v63, 0.0  ;;  %v1673_v46 = vmul.f32 0.01, %v858_v63  ;;  %v810_v30 = vpop.f32.mrf.mxu2  ;;  %v1823_v42 = vsel %vm107_vm0, %v3555_v51, 0 }
 0x13a   :  { %v861_v26 = vpop.f32.mrf.mxu3  ;;  %v751_v6 = vpop.f32.mrf.mxu1  ;;  %v4030_v56 = vand.u32 4294901760, %v1823_v42 }
 0x13b   :  { %1185 = vmatmul.f32.gmra.mxu0 %v3770_v61  ;;  %v1705_v48 = vsel %vm1641_vm14, %v858_v63, %v1673_v46  ;;  %v752_v33 = vadd.f32 %v751_v6, %v687_v23  ;;  %v67_v6 = vld [vmem:[#allocation3 + $0xc8] sm:$0xff] }
 0x13c   :  { %v1737_v24 = vmul.f32 %v1705_v48, %v59_v5  ;;  %v1932_v38 = vsub.f32 %v1823_v42, %v4030_v56  ;;  %1849 = vmatpush.msra.mxu0 %v4030_v56  ;;  %2052 = vmatpush.msra.mxu3 %v4030_v56 }
 0x13d   :  { %v811_v25 = vadd.f32 %v810_v30, %v752_v33  ;;  %1236 = vmatmul.f32.gmra.mxu1 %v3770_v61 }
 0x13e   :  { %v1768_v31 = vadd.f32 %v1767_v62, %v1737_v24  ;;  %1319 = vmatmul.f32.gmra.mxu2 %v3821_v16  ;;  %v1933_v19 = vand.u32 4294901760, %v1932_v38 }
 0x13f   :  { %1382 = vmatmul.f32.gmra.mxu3 %v3790_v4  ;;  %v862_v35 = vadd.f32 %v861_v26, %v811_v25  ;;  %1992 = vmatpush.msra.mxu2 %v1932_v38 }
 0x140   :  { %v691_v36 = vpop.f32.mrf.mxu0 }
 0x141   :  { %v692_v1 = vadd.f32 %v691_v36, %v3983_v13  ;;  %vm1645_vm15 = vcmp.gt.f32.partialorder %v862_v35, 0.0  ;;  %v1677_v41 = vmul.f32 0.01, %v862_v35  ;;  %v814_v49 = vpop.f32.mrf.mxu2  ;;  %v1934_v13 = vsub.f32 %v1932_v38, %v1933_v19 }
 0x142   :  { %v865_v8 = vpop.f32.mrf.mxu3  ;;  %v757_v47 = vpop.f32.mrf.mxu1 }
 0x143   :  { %1189 = vmatmul.f32.gmra.mxu0 %v3790_v4  ;;  %v1709_v34 = vsel %vm1645_vm15, %v862_v35, %v1677_v41  ;;  %v758_v58 = vadd.f32 %v757_v47, %v692_v1  ;;  %v1935_v23 = vand.u32 4294901760, %v1934_v13  ;;  %v3551_v1 = vld [vmem:[%s4522_s0 + $0x40] sm:$0xff] }
 0x144   :  { %v1741_v62 = vmul.f32 %v1709_v34, %v63_v40  ;;  %v1850_v38 = vand.u32 4294901760, %v3551_v1  ;;  %v71_v40 = vld [vmem:[#allocation3 + $0xe8] sm:$0xff] }
 0x145   :  { %v815_v63 = vadd.f32 %v814_v49, %v758_v58  ;;  %1240 = vmatmul.f32.gmra.mxu1 %v3790_v4 }
 0x146   :  { %v1769_v27 = vadd.f32 %v1768_v31, %v1741_v62  ;;  %1327 = vmatmul.f32.gmra.mxu2 %v3832_v21  ;;  %1936 = vmatpush.msra.mxu1 %v1935_v23  ;;  %v1938_v34 = vsub.f32 %v3551_v1, %v1850_v38 }
 0x147   :  { %1386 = vmatmul.f32.gmra.mxu3 %v3810_v12  ;;  %v866_v5 = vadd.f32 %v865_v8, %v815_v63  ;;  %1851 = vmatpush.msra.mxu0 %v1850_v38 }
 0x148   :  { %v696_v46 = vpop.f32.mrf.mxu0  ;;  %2054 = vmatpush.msra.mxu3 %v1850_v38  ;;  %1995 = vmatpush.msra.mxu2 %v1938_v34 }
 0x149   :  { %v697_v26 = vadd.f32 %v696_v46, %v3990_v37  ;;  %vm1649_vm1 = vcmp.gt.f32.partialorder %v866_v5, 0.0  ;;  %v1681_v30 = vmul.f32 0.01, %v866_v5  ;;  %v818_v24 = vpop.f32.mrf.mxu2  ;;  %v1939_v46 = vand.u32 4294901760, %v1938_v34 }
 0x14a   :  { %v869_v48 = vpop.f32.mrf.mxu3  ;;  %v763_v33 = vpop.f32.mrf.mxu1 }
 0x14b   :  { %1193 = vmatmul.f32.gmra.mxu0 %v3810_v12  ;;  %v1713_v51 = vsel %vm1649_vm1, %v866_v5, %v1681_v30  ;;  %v764_v25 = vadd.f32 %v763_v33, %v697_v26 }
 0x14c   :  { %v1745_v42 = vmul.f32 %v1713_v51, %v67_v6  ;;  %v1940_v6 = vsub.f32 %v1938_v34, %v1939_v46 }
 0x14d   :  { %v819_v31 = vadd.f32 %v818_v24, %v764_v25  ;;  %1244 = vmatmul.f32.gmra.mxu1 %v3810_v12 }
 0x14e   :  { %v1770_v35 = vadd.f32 %v1769_v27, %v1745_v42  ;;  %1541 = vmatmul.f32.vlgmr.msrb.gmra.mxu2 %v3670_v9  ;;  %v1941_v33 = vand.u32 4294901760, %v1940_v6 }
 0x14f   :  { %1592 = vmatmul.f32.vlgmr.msrb.gmra.mxu3 %v3670_v9  ;;  %v870_v36 = vadd.f32 %v869_v48, %v819_v31 }
 0x150   :  { %v896_v37 = vpop.f32.mrf.mxu0  ;;  %1942 = vmatpush.msra.mxu1 %v1941_v33 }
 0x151   :  { %vm1653_vm2 = vcmp.gt.f32.partialorder %v870_v36, 0.0  ;;  %v1685_v41 = vmul.f32 0.01, %v870_v36  ;;  %v1037_v49 = vpop.f32.mrf.mxu2 }
 0x152   :  { %v1097_v8 = vpop.f32.mrf.mxu3  ;;  %v983_v47 = vpop.f32.mrf.mxu1 }
 0x153   :  { %1412 = vmatmul.f32.vlgmr.msrb.gmra.mxu0 %v3683_v17  ;;  %v1717_v58 = vsel %vm1653_vm2, %v870_v36, %v1685_v41  ;;  %v984_v62 = vadd.f32 %v983_v47, %v896_v37 }
 0x154   :  { %v1749_v13 = vmul.f32 %v1717_v58, %v71_v40  ;;  %2121 = vmatpush.msrb.mxu0 %v1933_v19  ;;  %v3556_v58 = vld [vmem:[%s4522_s0 + $0x68] sm:$0x3] }
 0x155   :  { %v1038_v63 = vadd.f32 %v1037_v49, %v984_v62  ;;  %1472 = vmatmul.f32.vlgmr.msrb.gmra.mxu1 %v3692_v22 }
 0x156   :  { %v4051_v27 = vadd.f32 %v1770_v35, %v1749_v13  ;;  %1545 = vmatmul.f32.gmra.mxu2 %v3680_v15  ;;  %2125 = vmatpush.msrb.mxu0 %v1939_v46  ;;  %v1826_v13 = vsel %vm107_vm0, %v3556_v58, 0 }
 0x157   :  { %1596 = vmatmul.f32.gmra.mxu3 %v3680_v15  ;;  %v4054_v23 = vadd.f32 %v1097_v8, %v1038_v63  ;;  %2174 = vmatpush.msrb.mxu1 %v4030_v56  ;;  %v4081_v46 = vand.u32 4294901760, %v1826_v13 }
 0x158   :  { %v904_v5 = vpop.f32.mrf.mxu0 }
 0x159   :  { %v1042_v19 = vpop.f32.mrf.mxu2  ;;  %2176 = vmatpush.msrb.mxu1 %v1850_v38  ;;  %2225 = vmatpush.msrb.mxu2 %v4081_v46  ;;  %v2308_v6 = vsub.f32 %v1826_v13, %v4081_v46 }
 0x15a   :  { %v1103_v26 = vpop.f32.mrf.mxu3  ;;  %v987_v30 = vpop.f32.mrf.mxu1 }
 0x15b   :  { %1417 = vmatmul.f32.gmra.mxu0 %v3687_v20  ;;  %v988_v48 = vadd.f32 %v987_v30, %v904_v5  ;;  %v2309_v33 = vand.u32 4294901760, %v2308_v6 }
 0x15d   :  { %v1043_v24 = vadd.f32 %v1042_v19, %v988_v48  ;;  %1478 = vmatmul.f32.gmra.mxu1 %v3699_v28 }
 0x15e   :  { %1549 = vmatmul.f32.gmra.mxu2 %v3701_v29 }
 0x15f   :  { %1600 = vmatmul.f32.gmra.mxu3 %v3701_v29  ;;  %v4060_v51 = vadd.f32 %v1103_v26, %v1043_v24 }
 0x160   :  { %v912_v25 = vpop.f32.mrf.mxu0 }
 0x161   :  { %v1047_v35 = vpop.f32.mrf.mxu2 }
 0x162   :  { %v1109_v42 = vpop.f32.mrf.mxu3  ;;  %v991_v31 = vpop.f32.mrf.mxu1 }
 0x163   :  { %1422 = vmatmul.f32.gmra.mxu0 %v3717_v39  ;;  %v992_v36 = vadd.f32 %v991_v31, %v912_v25  ;;  %v2310_v25 = vsub.f32 %v2308_v6, %v2309_v33 }
 0x165   :  { %v1048_v37 = vadd.f32 %v1047_v35, %v992_v36  ;;  %1484 = vmatmul.f32.gmra.mxu1 %v3725_v44  ;;  %v2311_v36 = vand.u32 4294901760, %v2310_v25  ;;  %v3552_v25 = vld [vmem:[%s4522_s0 + $0x48] sm:$0xff] }
 0x166   :  { %1553 = vmatmul.f32.gmra.mxu2 %v3727_v45 }
 0x167   :  { %1604 = vmatmul.f32.gmra.mxu3 %v3727_v45  ;;  %v4067_v1 = vadd.f32 %v1109_v42, %v1048_v37 }
 0x168   :  { %v920_v40 = vpop.f32.mrf.mxu0  ;;  %2312 = vmatpush.msrb.mxu3 %v2311_v36 }
 0x169   :  { %v1052_v56 = vpop.f32.mrf.mxu2 }
 0x16a   :  { %v1115_v41 = vpop.f32.mrf.mxu3  ;;  %v995_v8 = vpop.f32.mrf.mxu1 }
 0x16b   :  { %1427 = vmatmul.f32.gmra.mxu0 %v3739_v50  ;;  %v996_v38 = vadd.f32 %v995_v8, %v920_v40 }
 0x16d   :  { %v1053_v47 = vadd.f32 %v1052_v56, %v996_v38  ;;  %1490 = vmatmul.f32.gmra.mxu1 %v3748_v53 }
 0x16e   :  { %1557 = vmatmul.f32.gmra.mxu2 %v3750_v54 }
 0x16f   :  { %1608 = vmatmul.f32.gmra.mxu3 %v3750_v54  ;;  %v4073_v49 = vadd.f32 %v1115_v41, %v1053_v47 }
 0x170   :  { %v928_v34 = vpop.f32.mrf.mxu0 }
 0x171   :  { %v1057_v5 = vpop.f32.mrf.mxu2 }
 0x172   :  { %v1121_v62 = vpop.f32.mrf.mxu3  ;;  %v999_v63 = vpop.f32.mrf.mxu1 }
 0x173   :  { %1432 = vmatmul.f32.gmra.mxu0 %v3760_v57  ;;  %v1000_v26 = vadd.f32 %v999_v63, %v928_v34 }
 0x175   :  { %v1058_v30 = vadd.f32 %v1057_v5, %v1000_v26  ;;  %1496 = vmatmul.f32.gmra.mxu1 %v3768_v60 }
 0x176   :  { %1561 = vmatmul.f32.gmra.mxu2 %v3770_v61 }
 0x177   :  { %1612 = vmatmul.f32.gmra.mxu3 %v3770_v61  ;;  %v4087_v19 = vadd.f32 %v1121_v62, %v1058_v30 }
 0x178   :  { %v936_v48 = vpop.f32.mrf.mxu0 }
 0x179   :  { %v1062_v31 = vpop.f32.mrf.mxu2 }
 0x17a   :  { %v1127_v24 = vpop.f32.mrf.mxu3  ;;  %v1003_v42 = vpop.f32.mrf.mxu1 }
 0x17b   :  { %1437 = vmatmul.f32.gmra.mxu0 %v3780_v0  ;;  %v1004_v35 = vadd.f32 %v1003_v42, %v936_v48 }
 0x17d   :  { %v1063_v37 = vadd.f32 %v1062_v31, %v1004_v35  ;;  %1502 = vmatmul.f32.gmra.mxu1 %v3788_v3  ;;  %v2226_v35 = vand.u32 4294901760, %v3552_v25 }
 0x17e   :  { %1565 = vmatmul.f32.gmra.mxu2 %v3790_v4 }
 0x17f   :  { %1616 = vmatmul.f32.gmra.mxu3 %v3790_v4  ;;  %v4093_v40 = vadd.f32 %v1127_v24, %v1063_v37  ;;  %2227 = vmatpush.msrb.mxu2 %v2226_v35 }
 0x180   :  { %v944_v41 = vpop.f32.mrf.mxu0 }
 0x181   :  { %v1067_v38 = vpop.f32.mrf.mxu2 }
 0x182   :  { %v1133_v8 = vpop.f32.mrf.mxu3  ;;  %v1007_v56 = vpop.f32.mrf.mxu1 }
 0x183   :  { %1442 = vmatmul.f32.gmra.mxu0 %v3800_v7  ;;  %v1008_v47 = vadd.f32 %v1007_v56, %v944_v41 }
 0x185   :  { %v1068_v34 = vadd.f32 %v1067_v38, %v1008_v47  ;;  %1508 = vmatmul.f32.gmra.mxu1 %v3808_v11 }
 0x186   :  { %1569 = vmatmul.f32.gmra.mxu2 %v3810_v12 }
 0x187   :  { %1620 = vmatmul.f32.gmra.mxu3 %v3810_v12  ;;  %v4099_v58 = vadd.f32 %v1133_v8, %v1068_v34 }
 0x188   :  { %v952_v62 = vpop.f32.mrf.mxu0 }
 0x189   :  { %v1072_v5 = vpop.f32.mrf.mxu2 }
 0x18a   :  { %v1139_v13 = vpop.f32.mrf.mxu3  ;;  %v1011_v63 = vpop.f32.mrf.mxu1 }
 0x18b   :  { %1447 = vmatmul.f32.gmra.mxu0 %v3817_v14  ;;  %v1012_v26 = vadd.f32 %v1011_v63, %v952_v62 }
 0x18d   :  { %v1073_v30 = vadd.f32 %v1072_v5, %v1012_v26  ;;  %1514 = vmatmul.f32.gmra.mxu1 %v3824_v18 }
 0x18e   :  { %1998 = vmatmul.f32.vlgmr.msra.gmra.mxu2 %v3683_v17 }
 0x18f   :  { %2058 = vmatmul.f32.vlgmr.msra.gmra.mxu3 %v3692_v22  ;;  %v4105_v48 = vadd.f32 %v1139_v13, %v1073_v30  ;;  %2497 = vmatpush.msra.mxu2 %v2309_v33 }
 0x190   :  { %v1166_v24 = vpop.f32.mrf.mxu0 }
 0x191   :  { %v1167_v42 = vadd.f32 %v1166_v24, %v4054_v23  ;;  %v1272_v37 = vpop.f32.mrf.mxu2  ;;  %v2314_v23 = vsub.f32 %v3552_v25, %v2226_v35  ;;  %v44_v24 = vld [vmem:[#allocation3 + $0x10] sm:$0xff] }
 0x192   :  { %v1359_v31 = vpop.f32.mrf.mxu3  ;;  %v1217_v36 = vpop.f32.mrf.mxu1  ;;  %v48_v25 = vld [vmem:[#allocation3 + $0x30] sm:$0xff] }
 0x193   :  { %1857 = vmatmul.f32.vlgmr.msra.gmra.mxu0 %v3708_v32  ;;  %v4113_v41 = vadd.f32 %v1359_v31, %v1272_v37  ;;  %v1218_v8 = vadd.f32 %v1217_v36, %v1167_v42  ;;  %v2315_v62 = vand.u32 4294901760, %v2314_v23 }
 0x194   :  { %2368 = vmatpush.msra.mxu0 %v2308_v6 }
 0x195   :  { %1944 = vmatmul.f32.vlgmr.msra.gmra.mxu1 %v3670_v9  ;;  %v1658_v47 = vmul.f32 0.01, %v1218_v8  ;;  %vm1626_vm3 = vcmp.gt.f32.partialorder %v1218_v8, 0.0  ;;  %v2316_v5 = vsub.f32 %v2314_v23, %v2315_v62  ;;  %2501 = vmatpush.msra.mxu2 %v2315_v62 }
 0x196   :  { %2428 = vmatpush.msra.mxu1 %v4081_v46  ;;  %2003 = vmatmul.f32.gmra.mxu2 %v3687_v20 }
 0x197   :  { %2064 = vmatmul.f32.gmra.mxu3 %v3699_v28  ;;  %2371 = vmatpush.msra.mxu0 %v2314_v23  ;;  %v1690_v26 = vsel %vm1626_vm3, %v1218_v8, %v1658_v47 }
 0x198   :  { %v1170_v56 = vpop.f32.mrf.mxu0  ;;  %2430 = vmatpush.msra.mxu1 %v2226_v35  ;;  %v1722_v37 = vmul.f32 %v1690_v26, %v44_v24 }
 0x199   :  { %v1171_v38 = vadd.f32 %v1170_v56, %v4060_v51  ;;  %v1280_v33 = vpop.f32.mrf.mxu2  ;;  %v2317_v51 = vand.u32 4294901760, %v2316_v5 }
 0x19a   :  { %v1363_v34 = vpop.f32.mrf.mxu3  ;;  %v1221_v6 = vpop.f32.mrf.mxu1 }
 0x19b   :  { %1865 = vmatmul.f32.gmra.mxu0 %v3722_v43  ;;  %v1222_v13 = vadd.f32 %v1221_v6, %v1171_v38  ;;  %v4121_v63 = vadd.f32 %v1363_v34, %v1280_v33  ;;  %2318 = vmatpush.msrb.mxu3 %v2317_v51  ;;  %v52_v33 = vld [vmem:[#allocation3 + $0x50] sm:$0xff] }
 0x19d   :  { %vm1630_vm4 = vcmp.gt.f32.partialorder %v1222_v13, 0.0  ;;  %v1662_v30 = vmul.f32 0.01, %v1222_v13  ;;  %1948 = vmatmul.f32.gmra.mxu1 %v3680_v15  ;;  %2550 = vmatpush.msra.mxu3 %v4081_v46 }
 0x19e   :  { %2008 = vmatmul.f32.gmra.mxu2 %v3717_v39 }
 0x19f   :  { %2070 = vmatmul.f32.gmra.mxu3 %v3725_v44  ;;  %v1694_v42 = vsel %vm1630_vm4, %v1222_v13, %v1662_v30 }
 0x1a0   :  { %v1174_v31 = vpop.f32.mrf.mxu0  ;;  %v1726_v8 = vmul.f32 %v1694_v42, %v48_v25  ;;  %2552 = vmatpush.msra.mxu3 %v2226_v35 }
 0x1a1   :  { %v1175_v36 = vadd.f32 %v1174_v31, %v4067_v1  ;;  %v1288_v38 = vpop.f32.mrf.mxu2  ;;  %v56_v31 = vld [vmem:[#allocation3 + $0x70] sm:$0xff] }
 0x1a2   :  { %v1367_v56 = vpop.f32.mrf.mxu3  ;;  %v1225_v23 = vpop.f32.mrf.mxu1  ;;  %v1778_v47 = vadd.f32 %v1726_v8, %v1722_v37 }
 0x1a3   :  { %1873 = vmatmul.f32.gmra.mxu0 %v3745_v52  ;;  %v1226_v34 = vadd.f32 %v1225_v23, %v1175_v36  ;;  %v4129_v62 = vadd.f32 %v1367_v56, %v1288_v38 }
 0x1a5   :  { %vm1634_vm5 = vcmp.gt.f32.partialorder %v1226_v34, 0.0  ;;  %v1666_v6 = vmul.f32 0.01, %v1226_v34  ;;  %1952 = vmatmul.f32.gmra.mxu1 %v3701_v29 }
 0x1a6   :  { %2013 = vmatmul.f32.gmra.mxu2 %v3739_v50 }
 0x1a7   :  { %2076 = vmatmul.f32.gmra.mxu3 %v3748_v53  ;;  %v1698_v1 = vsel %vm1634_vm5, %v1226_v34, %v1666_v6 }
 0x1a8   :  { %v1178_v46 = vpop.f32.mrf.mxu0  ;;  %v1730_v5 = vmul.f32 %v1698_v1, %v52_v33  ;;  %v60_v1 = vld [vmem:[#allocation3 + $0x90] sm:$0xff] }
 0x1a9   :  { %v1179_v13 = vadd.f32 %v1178_v46, %v4073_v49  ;;  %v1296_v30 = vpop.f32.mrf.mxu2 }
 0x1aa   :  { %v1371_v26 = vpop.f32.mrf.mxu3  ;;  %v1229_v35 = vpop.f32.mrf.mxu1  ;;  %v1779_v51 = vadd.f32 %v1778_v47, %v1730_v5 }
 0x1ab   :  { %1881 = vmatmul.f32.gmra.mxu0 %v3765_v59  ;;  %v1230_v24 = vadd.f32 %v1229_v35, %v1179_v13  ;;  %v4136_v25 = vadd.f32 %v1371_v26, %v1296_v30 }
 0x1ad   :  { %vm1638_vm6 = vcmp.gt.f32.partialorder %v1230_v24, 0.0  ;;  %v1670_v42 = vmul.f32 0.01, %v1230_v24  ;;  %1956 = vmatmul.f32.gmra.mxu1 %v3727_v45 }
 0x1ae   :  { %2018 = vmatmul.f32.gmra.mxu2 %v3760_v57 }
 0x1af   :  { %2082 = vmatmul.f32.gmra.mxu3 %v3768_v60  ;;  %v1702_v36 = vsel %vm1638_vm6, %v1230_v24, %v1670_v42 }
 0x1b0   :  { %v1182_v37 = vpop.f32.mrf.mxu0  ;;  %v1734_v8 = vmul.f32 %v1702_v36, %v56_v31  ;;  %v64_v36 = vld [vmem:[#allocation3 + $0xb0] sm:$0xff] }
 0x1b1   :  { %v1183_v49 = vadd.f32 %v1182_v37, %v4087_v19  ;;  %v1304_v38 = vpop.f32.mrf.mxu2 }
 0x1b2   :  { %v1375_v56 = vpop.f32.mrf.mxu3  ;;  %v1233_v23 = vpop.f32.mrf.mxu1  ;;  %v1780_v47 = vadd.f32 %v1779_v51, %v1734_v8 }
 0x1b3   :  { %1889 = vmatmul.f32.gmra.mxu0 %v3785_v2  ;;  %v1234_v34 = vadd.f32 %v1233_v23, %v1183_v49  ;;  %v4143_v6 = vadd.f32 %v1375_v56, %v1304_v38 }
 0x1b5   :  { %vm1642_vm7 = vcmp.gt.f32.partialorder %v1234_v34, 0.0  ;;  %v1674_v33 = vmul.f32 0.01, %v1234_v34  ;;  %1960 = vmatmul.f32.gmra.mxu1 %v3750_v54 }
 0x1b6   :  { %2023 = vmatmul.f32.gmra.mxu2 %v3780_v0 }
 0x1b7   :  { %2088 = vmatmul.f32.gmra.mxu3 %v3788_v3  ;;  %v1706_v46 = vsel %vm1642_vm7, %v1234_v34, %v1674_v33 }
 0x1b8   :  { %v1186_v13 = vpop.f32.mrf.mxu0  ;;  %v1738_v5 = vmul.f32 %v1706_v46, %v60_v1  ;;  %v68_v46 = vld [vmem:[#allocation3 + $0xd0] sm:$0xff] }
 0x1b9   :  { %v1187_v19 = vadd.f32 %v1186_v13, %v4093_v40  ;;  %v1312_v30 = vpop.f32.mrf.mxu2 }
 0x1ba   :  { %v1379_v26 = vpop.f32.mrf.mxu3  ;;  %v1237_v35 = vpop.f32.mrf.mxu1  ;;  %v1781_v51 = vadd.f32 %v1780_v47, %v1738_v5 }
 0x1bb   :  { %1897 = vmatmul.f32.gmra.mxu0 %v3805_v10  ;;  %v1238_v24 = vadd.f32 %v1237_v35, %v1187_v19  ;;  %v4150_v42 = vadd.f32 %v1379_v26, %v1312_v30 }
 0x1bd   :  { %vm1646_vm8 = vcmp.gt.f32.partialorder %v1238_v24, 0.0  ;;  %v1678_v31 = vmul.f32 0.01, %v1238_v24  ;;  %1964 = vmatmul.f32.gmra.mxu1 %v3770_v61 }
 0x1be   :  { %2028 = vmatmul.f32.gmra.mxu2 %v3800_v7 }
 0x1bf   :  { %2094 = vmatmul.f32.gmra.mxu3 %v3808_v11  ;;  %v1710_v37 = vsel %vm1646_vm8, %v1238_v24, %v1678_v31 }
 0x1c0   :  { %v1190_v49 = vpop.f32.mrf.mxu0  ;;  %v1742_v8 = vmul.f32 %v1710_v37, %v64_v36  ;;  %v72_v37 = vld [vmem:[#allocation3 + $0xf0] sm:$0xff] }
 0x1c1   :  { %v1191_v40 = vadd.f32 %v1190_v49, %v4099_v58  ;;  %v1320_v38 = vpop.f32.mrf.mxu2 }
 0x1c2   :  { %v1383_v56 = vpop.f32.mrf.mxu3  ;;  %v1241_v23 = vpop.f32.mrf.mxu1  ;;  %v1782_v47 = vadd.f32 %v1781_v51, %v1742_v8 }
 0x1c3   :  { %1905 = vmatmul.f32.gmra.mxu0 %v3821_v16  ;;  %v1242_v34 = vadd.f32 %v1241_v23, %v1191_v40  ;;  %v4157_v33 = vadd.f32 %v1383_v56, %v1320_v38 }
 0x1c5   :  { %vm1650_vm9 = vcmp.gt.f32.partialorder %v1242_v34, 0.0  ;;  %v1682_v1 = vmul.f32 0.01, %v1242_v34  ;;  %1968 = vmatmul.f32.gmra.mxu1 %v3790_v4 }
 0x1c6   :  { %2033 = vmatmul.f32.gmra.mxu2 %v3817_v14 }
 0x1c7   :  { %2100 = vmatmul.f32.gmra.mxu3 %v3824_v18  ;;  %v1714_v13 = vsel %vm1650_vm9, %v1242_v34, %v1682_v1 }
 0x1c8   :  { %v1194_v19 = vpop.f32.mrf.mxu0  ;;  %v1746_v5 = vmul.f32 %v1714_v13, %v68_v46 }
 0x1c9   :  { %v1195_v58 = vadd.f32 %v1194_v19, %v4105_v48  ;;  %v1328_v30 = vpop.f32.mrf.mxu2 }
 0x1ca   :  { %v1387_v26 = vpop.f32.mrf.mxu3  ;;  %v1245_v35 = vpop.f32.mrf.mxu1  ;;  %v1783_v51 = vadd.f32 %v1782_v47, %v1746_v5 }
 0x1cb   :  { %1913 = vmatmul.f32.gmra.mxu0 %v3832_v21  ;;  %v1246_v24 = vadd.f32 %v1245_v35, %v1195_v58  ;;  %v4164_v31 = vadd.f32 %v1387_v26, %v1328_v30 }
 0x1cd   :  { %vm1654_vm10 = vcmp.gt.f32.partialorder %v1246_v24, 0.0  ;;  %v1686_v36 = vmul.f32 0.01, %v1246_v24  ;;  %1972 = vmatmul.f32.gmra.mxu1 %v3810_v12 }
 0x1ce   :  { %2233 = vmatmul.f32.vlgmr.msrb.gmra.mxu2 %v3708_v32 }
 0x1cf   :  { %2320 = vmatmul.f32.vlgmr.msrb.gmra.mxu3 %v3670_v9  ;;  %v1718_v49 = vsel %vm1654_vm10, %v1246_v24, %v1686_v36 }
 0x1d0   :  { %v1413_v40 = vpop.f32.mrf.mxu0  ;;  %v1750_v8 = vmul.f32 %v1718_v49, %v72_v37  ;;  %v45_v37 = vld [vmem:[#allocation3 + $0x18] sm:$0xff] }
 0x1d1   :  { %v1414_v48 = vadd.f32 %v1413_v40, %v4113_v41  ;;  %v1542_v38 = vpop.f32.mrf.mxu2 }
 0x1d2   :  { %v1593_v56 = vpop.f32.mrf.mxu3  ;;  %v1473_v23 = vpop.f32.mrf.mxu1  ;;  %v4171_v47 = vadd.f32 %v1783_v51, %v1750_v8 }
 0x1d3   :  { %2127 = vmatmul.f32.vlgmr.msrb.gmra.mxu0 %v3670_v9  ;;  %v1474_v34 = vadd.f32 %v1473_v23, %v1414_v48  ;;  %v49_v48 = vld [vmem:[#allocation3 + $0x38] sm:$0xff] }
 0x1d5   :  { %v1543_v1 = vadd.f32 %v1542_v38, %v1474_v34  ;;  %2178 = vmatmul.f32.vlgmr.msrb.gmra.mxu1 %v3670_v9 }
 0x1d6   :  { %2241 = vmatmul.f32.gmra.mxu2 %v3722_v43 }
 0x1d7   :  { %2324 = vmatmul.f32.gmra.mxu3 %v3680_v15  ;;  %v1594_v46 = vadd.f32 %v1593_v56, %v1543_v1 }
 0x1d8   :  { %v1418_v13 = vpop.f32.mrf.mxu0 }
 0x1d9   :  { %v1419_v41 = vadd.f32 %v1418_v13, %v4121_v63  ;;  %v1546_v5 = vpop.f32.mrf.mxu2  ;;  %v1659_v26 = vmul.f32 0.01, %v1594_v46  ;;  %vm1627_vm11 = vcmp.gt.f32.partialorder %v1594_v46, 0.0 }
 0x1da   :  { %v1597_v19 = vpop.f32.mrf.mxu3  ;;  %v1479_v58 = vpop.f32.mrf.mxu1 }
 0x1db   :  { %2131 = vmatmul.f32.gmra.mxu0 %v3680_v15  ;;  %v1480_v35 = vadd.f32 %v1479_v58, %v1419_v41  ;;  %v1691_v51 = vsel %vm1627_vm11, %v1594_v46, %v1659_v26 }
 0x1dc   :  { %v1723_v23 = vmul.f32 %v1691_v51, %v45_v37 }
 0x1dd   :  { %v1547_v30 = vadd.f32 %v1546_v5, %v1480_v35  ;;  %2182 = vmatmul.f32.gmra.mxu1 %v3680_v15 }
 0x1de   :  { %2249 = vmatmul.f32.gmra.mxu2 %v3745_v52 }
 0x1df   :  { %2328 = vmatmul.f32.gmra.mxu3 %v3701_v29  ;;  %v1598_v24 = vadd.f32 %v1597_v19, %v1547_v30  ;;  %v53_v30 = vld [vmem:[#allocation3 + $0x58] sm:$0xff] }
 0x1e0   :  { %v1423_v36 = vpop.f32.mrf.mxu0 }
 0x1e1   :  { %v1424_v63 = vadd.f32 %v1423_v36, %v4129_v62  ;;  %vm1631_vm12 = vcmp.gt.f32.partialorder %v1598_v24, 0.0  ;;  %v1663_v49 = vmul.f32 0.01, %v1598_v24  ;;  %v1550_v56 = vpop.f32.mrf.mxu2  ;;  %v1792_v62 = vsel %vm1791_vm13, %v1723_v23, 0.0 }
 0x1e2   :  { %v1601_v40 = vpop.f32.mrf.mxu3  ;;  %v1485_v8 = vpop.f32.mrf.mxu1 }
 0x1e3   :  { %2135 = vmatmul.f32.gmra.mxu0 %v3701_v29  ;;  %v1695_v38 = vsel %vm1631_vm12, %v1598_v24, %v1663_v49  ;;  %v1486_v34 = vadd.f32 %v1485_v8, %v1424_v63 }
 0x1e4   :  { %v1727_v1 = vmul.f32 %v1695_v38, %v49_v48 }
 0x1e5   :  { %v1551_v46 = vadd.f32 %v1550_v56, %v1486_v34  ;;  %2186 = vmatmul.f32.gmra.mxu1 %v3701_v29  ;;  %v57_v34 = vld [vmem:[#allocation3 + $0x78] sm:$0xff] }
 0x1e6   :  { %v1793_v13 = vsel %vm1791_vm13, %v1727_v1, 0.0  ;;  %2257 = vmatmul.f32.gmra.mxu2 %v3765_v59 }
 0x1e7   :  { %2332 = vmatmul.f32.gmra.mxu3 %v3727_v45  ;;  %v1602_v41 = vadd.f32 %v1601_v40, %v1551_v46  ;;  %v1794_v58 = vadd.f32 %v1793_v13, %v1792_v62 }
 0x1e8   :  { %v1428_v19 = vpop.f32.mrf.mxu0 }
 0x1e9   :  { %v1429_v5 = vadd.f32 %v1428_v19, %v4136_v25  ;;  %vm1635_vm14 = vcmp.gt.f32.partialorder %v1602_v41, 0.0  ;;  %v1667_v26 = vmul.f32 0.01, %v1602_v41  ;;  %v1554_v24 = vpop.f32.mrf.mxu2 }
 0x1ea   :  { %v1605_v35 = vpop.f32.mrf.mxu3  ;;  %v1491_v51 = vpop.f32.mrf.mxu1 }
 0x1eb   :  { %2139 = vmatmul.f32.gmra.mxu0 %v3727_v45  ;;  %v1699_v36 = vsel %vm1635_vm14, %v1602_v41, %v1667_v26  ;;  %v1492_v37 = vadd.f32 %v1491_v51, %v1429_v5  ;;  %v3557_v41 = vld [vmem:[%s4522_s0 + $0x70] sm:$0x3]  ;;  %vm3526_vm14 = vcmask 1040384  }
 0x1ec   :  { %v1731_v63 = vmul.f32 %v1699_v36, %v53_v30  ;;  %v1829_v19 = vsel %vm107_vm0, %v3557_v41, 0 }
 0x1ed   :  { %v1555_v49 = vadd.f32 %v1554_v24, %v1492_v37  ;;  %2190 = vmatmul.f32.gmra.mxu1 %v3727_v45 }
 0x1ee   :  { %v1795_v40 = vsel %vm1791_vm13, %v1731_v63, 0.0  ;;  %2265 = vmatmul.f32.gmra.mxu2 %v3785_v2 }
 0x1ef   :  { %2336 = vmatmul.f32.gmra.mxu3 %v3750_v54  ;;  %v1606_v48 = vadd.f32 %v1605_v35, %v1555_v49  ;;  %v1796_v8 = vadd.f32 %v1795_v40, %v1794_v58  ;;  %v61_v40 = vld [vmem:[#allocation3 + $0x98] sm:$0xff] }
 0x1f0   :  { %v1433_v25 = vpop.f32.mrf.mxu0 }
 0x1f1   :  { %v1434_v56 = vadd.f32 %v1433_v25, %v4143_v6  ;;  %vm1639_vm15 = vcmp.gt.f32.partialorder %v1606_v48, 0.0  ;;  %v1671_v23 = vmul.f32 0.01, %v1606_v48  ;;  %v1558_v46 = vpop.f32.mrf.mxu2  ;;  %v4201_v6 = vand.u32 4294901760, %v1829_v19 }
 0x1f2   :  { %v1609_v38 = vpop.f32.mrf.mxu3  ;;  %v1497_v1 = vpop.f32.mrf.mxu1 }
 0x1f3   :  { %2143 = vmatmul.f32.gmra.mxu0 %v3750_v54  ;;  %v1703_v62 = vsel %vm1639_vm15, %v1606_v48, %v1671_v23  ;;  %v1498_v13 = vadd.f32 %v1497_v1, %v1434_v56  ;;  %v4207_v51 = vsub.f32 %v1829_v19, %v4201_v6  ;;  %2804 = vmatpush.msrb.mxu3 %v4201_v6 }
 0x1f4   :  { %v1735_v5 = vmul.f32 %v1703_v62, %v57_v34  ;;  %2601 = vmatpush.msrb.mxu0 %v4201_v6 }
 0x1f5   :  { %v1559_v58 = vadd.f32 %v1558_v46, %v1498_v13  ;;  %2194 = vmatmul.f32.gmra.mxu1 %v3750_v54  ;;  %2744 = vmatpush.msrb.mxu2 %v4207_v51  ;;  %v2685_v49 = vand.u32 4294901760, %v4207_v51 }
 0x1f6   :  { %v1797_v26 = vsel %vm1791_vm13, %v1735_v5, 0.0  ;;  %2273 = vmatmul.f32.gmra.mxu2 %v3805_v10 }
 0x1f7   :  { %2340 = vmatmul.f32.gmra.mxu3 %v3770_v61  ;;  %v1610_v35 = vadd.f32 %v1609_v38, %v1559_v58  ;;  %v1798_v24 = vadd.f32 %v1797_v26, %v1796_v8  ;;  %v65_v58 = vld [vmem:[#allocation3 + $0xb8] sm:$0xff] }
 0x1f8   :  { %v1438_v30 = vpop.f32.mrf.mxu0 }
 0x1f9   :  { %v1439_v36 = vadd.f32 %v1438_v30, %v4150_v42  ;;  %vm1643_vm1 = vcmp.gt.f32.partialorder %v1610_v35, 0.0  ;;  %v1675_v37 = vmul.f32 0.01, %v1610_v35  ;;  %v1562_v25 = vpop.f32.mrf.mxu2  ;;  %v2686_v42 = vsub.f32 %v4207_v51, %v2685_v49 }
 0x1fa   :  { %v1613_v63 = vpop.f32.mrf.mxu3  ;;  %v1503_v48 = vpop.f32.mrf.mxu1 }
 0x1fb   :  { %2147 = vmatmul.f32.gmra.mxu0 %v3770_v61  ;;  %v1707_v56 = vsel %vm1643_vm1, %v1610_v35, %v1675_v37  ;;  %v1504_v23 = vadd.f32 %v1503_v48, %v1439_v36  ;;  %v2687_v34 = vand.u32 4294901760, %v2686_v42  ;;  %v69_v42 = vld [vmem:[#allocation3 + $0xd8] sm:$0xff] }
 0x1fc   :  { %v1739_v8 = vmul.f32 %v1707_v56, %v61_v40 }
 0x1fd   :  { %v1563_v38 = vadd.f32 %v1562_v25, %v1504_v23  ;;  %2198 = vmatmul.f32.gmra.mxu1 %v3770_v61 }
 0x1fe   :  { %v1799_v1 = vsel %vm1791_vm13, %v1739_v8, 0.0  ;;  %2281 = vmatmul.f32.gmra.mxu2 %v3821_v16  ;;  %2688 = vmatpush.msrb.mxu1 %v2687_v34 }
 0x1ff   :  { %2344 = vmatmul.f32.gmra.mxu3 %v3790_v4  ;;  %v1614_v46 = vadd.f32 %v1613_v63, %v1563_v38  ;;  %v1800_v13 = vadd.f32 %v1799_v1, %v1798_v24 }
 0x200   :  { %v1443_v62 = vpop.f32.mrf.mxu0 }
 0x201   :  { %v1444_v41 = vadd.f32 %v1443_v62, %v4157_v33  ;;  %vm1647_vm2 = vcmp.gt.f32.partialorder %v1614_v46, 0.0  ;;  %v1679_v19 = vmul.f32 0.01, %v1614_v46  ;;  %v1566_v35 = vpop.f32.mrf.mxu2 }
 0x202   :  { %v1617_v5 = vpop.f32.mrf.mxu3  ;;  %v1509_v26 = vpop.f32.mrf.mxu1 }
 0x203   :  { %2151 = vmatmul.f32.gmra.mxu0 %v3790_v4  ;;  %v1711_v30 = vsel %vm1647_vm2, %v1614_v46, %v1679_v19  ;;  %v1510_v36 = vadd.f32 %v1509_v26, %v1444_v41  ;;  %v3553_v19 = vld [vmem:[%s4522_s0 + $0x50] sm:$0xff] }
 0x204   :  { %v1743_v37 = vmul.f32 %v1711_v30, %v65_v58  ;;  %v2602_v58 = vand.u32 4294901760, %v3553_v19  ;;  %v73_v30 = vld [vmem:[#allocation3 + $0xf8] sm:$0xff] }
 0x205   :  { %v1567_v40 = vadd.f32 %v1566_v35, %v1510_v36  ;;  %2202 = vmatmul.f32.gmra.mxu1 %v3790_v4 }
 0x206   :  { %v1801_v24 = vsel %vm1791_vm13, %v1743_v37, 0.0  ;;  %2289 = vmatmul.f32.gmra.mxu2 %v3832_v21  ;;  %2806 = vmatpush.msrb.mxu3 %v2602_v58 }
 0x207   :  { %2348 = vmatmul.f32.gmra.mxu3 %v3810_v12  ;;  %v1618_v63 = vadd.f32 %v1617_v5, %v1567_v40  ;;  %v1802_v48 = vadd.f32 %v1801_v24, %v1800_v13  ;;  %v2690_v40 = vsub.f32 %v3553_v19, %v2602_v58  ;;  %2603 = vmatpush.msrb.mxu0 %v2602_v58 }
 0x208   :  { %v1448_v33 = vpop.f32.mrf.mxu0 }
 0x209   :  { %v1449_v25 = vadd.f32 %v1448_v33, %v4164_v31  ;;  %vm1651_vm3 = vcmp.gt.f32.partialorder %v1618_v63, 0.0  ;;  %v1683_v56 = vmul.f32 0.01, %v1618_v63  ;;  %v1570_v38 = vpop.f32.mrf.mxu2  ;;  %2747 = vmatpush.msrb.mxu2 %v2690_v40 }
 0x20a   :  { %v1621_v23 = vpop.f32.mrf.mxu3  ;;  %v1515_v8 = vpop.f32.mrf.mxu1 }
 0x20b   :  { %2155 = vmatmul.f32.gmra.mxu0 %v3810_v12  ;;  %v1715_v34 = vsel %vm1651_vm3, %v1618_v63, %v1683_v56  ;;  %v1516_v1 = vadd.f32 %v1515_v8, %v1449_v25 }
 0x20c   :  { %v1747_v46 = vmul.f32 %v1715_v34, %v69_v42  ;;  %v2691_v42 = vand.u32 4294901760, %v2690_v40 }
 0x20d   :  { %v1571_v62 = vadd.f32 %v1570_v38, %v1516_v1  ;;  %2206 = vmatmul.f32.gmra.mxu1 %v3810_v12 }
 0x20e   :  { %v1803_v13 = vsel %vm1791_vm13, %v1747_v46, 0.0  ;;  %2503 = vmatmul.f32.vlgmr.msra.gmra.mxu2 %v3670_v9  ;;  %v2692_v34 = vsub.f32 %v2690_v40, %v2691_v42 }
 0x20f   :  { %2554 = vmatmul.f32.vlgmr.msra.gmra.mxu3 %v3670_v9  ;;  %v1622_v41 = vadd.f32 %v1621_v23, %v1571_v62  ;;  %v1804_v5 = vadd.f32 %v1803_v13, %v1802_v48 }
 0x210   :  { %v1858_v31 = vpop.f32.mrf.mxu0  ;;  %v2693_v46 = vand.u32 4294901760, %v2692_v34 }
 0x211   :  { %vm1655_vm4 = vcmp.gt.f32.partialorder %v1622_v41, 0.0  ;;  %v1687_v26 = vmul.f32 0.01, %v1622_v41  ;;  %v1999_v37 = vpop.f32.mrf.mxu2 }
 0x212   :  { %v2059_v35 = vpop.f32.mrf.mxu3  ;;  %v1945_v36 = vpop.f32.mrf.mxu1  ;;  %2694 = vmatpush.msrb.mxu1 %v2693_v46 }
 0x213   :  { %2374 = vmatmul.f32.vlgmr.msra.gmra.mxu0 %v3683_v17  ;;  %v1719_v24 = vsel %vm1655_vm4, %v1622_v41, %v1687_v26  ;;  %v1946_v63 = vadd.f32 %v1945_v36, %v1858_v31 }
 0x214   :  { %2873 = vmatpush.msra.mxu0 %v2685_v49  ;;  %v1751_v33 = vmul.f32 %v1719_v24, %v73_v30 }
 0x215   :  { %v2000_v48 = vadd.f32 %v1999_v37, %v1946_v63  ;;  %2434 = vmatmul.f32.vlgmr.msra.gmra.mxu1 %v3692_v22 }
 0x216   :  { %v1805_v25 = vsel %vm1791_vm13, %v1751_v33, 0.0  ;;  %2507 = vmatmul.f32.gmra.mxu2 %v3680_v15  ;;  %2877 = vmatpush.msra.mxu0 %v2691_v42 }
 0x217   :  { %2558 = vmatmul.f32.gmra.mxu3 %v3680_v15  ;;  %v4243_v56 = vadd.f32 %v2059_v35, %v2000_v48  ;;  %v4246_v8 = vadd.f32 %v1805_v25, %v1804_v5  ;;  %2926 = vmatpush.msra.mxu1 %v4201_v6  ;;  %v3558_v48 = vld [vmem:[%s4522_s0 + $0x78] sm:$0x3] }
 0x218   :  { %v1866_v23 = vpop.f32.mrf.mxu0 }
 0x219   :  { %v2004_v49 = vpop.f32.mrf.mxu2  ;;  %2928 = vmatpush.msra.mxu1 %v2602_v58 }
 0x21a   :  { %v2065_v38 = vpop.f32.mrf.mxu3  ;;  %v1949_v51 = vpop.f32.mrf.mxu1 }
 0x21b   :  { %2379 = vmatmul.f32.gmra.mxu0 %v3687_v20  ;;  %v1950_v1 = vadd.f32 %v1949_v51, %v1866_v23  ;;  %v1832_v23 = vsel %vm107_vm0, %v3558_v48, 0 }
 0x21c   :  { %v4272_v34 = vand.u32 4294901760, %v1832_v23 }
 0x21d   :  { %v2005_v62 = vadd.f32 %v2004_v49, %v1950_v1  ;;  %2440 = vmatmul.f32.gmra.mxu1 %v3699_v28 }
 0x21e   :  { %2511 = vmatmul.f32.gmra.mxu2 %v3701_v29  ;;  %v3060_v49 = vsub.f32 %v1832_v23, %v4272_v34 }
 0x21f   :  { %2562 = vmatmul.f32.gmra.mxu3 %v3701_v29  ;;  %v4251_v13 = vadd.f32 %v2065_v38, %v2005_v62  ;;  %2977 = vmatpush.msra.mxu2 %v4272_v34 }
 0x220   :  { %v1874_v41 = vpop.f32.mrf.mxu0 }
 0x221   :  { %v2009_v5 = vpop.f32.mrf.mxu2 }
 0x222   :  { %v2071_v31 = vpop.f32.mrf.mxu3  ;;  %v1953_v19 = vpop.f32.mrf.mxu1 }
 0x223   :  { %2384 = vmatmul.f32.gmra.mxu0 %v3717_v39  ;;  %v1954_v26 = vadd.f32 %v1953_v19, %v1874_v41  ;;  %v3061_v41 = vand.u32 4294901760, %v3060_v49 }
 0x225   :  { %v2010_v35 = vadd.f32 %v2009_v5, %v1954_v26  ;;  %2446 = vmatmul.f32.gmra.mxu1 %v3725_v44  ;;  %v3062_v26 = vsub.f32 %v3060_v49, %v3061_v41 }
 0x226   :  { %2515 = vmatmul.f32.gmra.mxu2 %v3727_v45 }
 0x227   :  { %2566 = vmatmul.f32.gmra.mxu3 %v3727_v45  ;;  %v4258_v30 = vadd.f32 %v2071_v31, %v2010_v35 }
 0x228   :  { %v1882_v36 = vpop.f32.mrf.mxu0 }
 0x229   :  { %v2014_v6 = vpop.f32.mrf.mxu2 }
 0x22a   :  { %v2077_v37 = vpop.f32.mrf.mxu3  ;;  %v1957_v40 = vpop.f32.mrf.mxu1 }
 0x22b   :  { %2389 = vmatmul.f32.gmra.mxu0 %v3739_v50  ;;  %v1958_v58 = vadd.f32 %v1957_v40, %v1882_v36  ;;  %v3063_v36 = vand.u32 4294901760, %v3062_v26 }
 0x22d   :  { %v2015_v24 = vadd.f32 %v2014_v6, %v1958_v58  ;;  %2452 = vmatmul.f32.gmra.mxu1 %v3748_v53  ;;  %3064 = vmatpush.msra.mxu3 %v3063_v36 }
 0x22e   :  { %2519 = vmatmul.f32.gmra.mxu2 %v3750_v54 }
 0x22f   :  { %2570 = vmatmul.f32.gmra.mxu3 %v3750_v54  ;;  %v4264_v63 = vadd.f32 %v2077_v37, %v2015_v24 }
 0x230   :  { %v1890_v33 = vpop.f32.mrf.mxu0 }
 0x231   :  { %v2019_v38 = vpop.f32.mrf.mxu2 }
 0x232   :  { %v2083_v25 = vpop.f32.mrf.mxu3  ;;  %v1961_v42 = vpop.f32.mrf.mxu1 }
 0x233   :  { %2394 = vmatmul.f32.gmra.mxu0 %v3760_v57  ;;  %v1962_v51 = vadd.f32 %v1961_v42, %v1890_v33 }
 0x235   :  { %v2020_v1 = vadd.f32 %v2019_v38, %v1962_v51  ;;  %2458 = vmatmul.f32.gmra.mxu1 %v3768_v60 }
 0x236   :  { %2523 = vmatmul.f32.gmra.mxu2 %v3770_v61 }
 0x237   :  { %2574 = vmatmul.f32.gmra.mxu3 %v3770_v61  ;;  %v4278_v46 = vadd.f32 %v2083_v25, %v2020_v1 }
 0x238   :  { %v1898_v62 = vpop.f32.mrf.mxu0 }
 0x239   :  { %v2024_v5 = vpop.f32.mrf.mxu2 }
 0x23a   :  { %v2089_v31 = vpop.f32.mrf.mxu3  ;;  %v1965_v19 = vpop.f32.mrf.mxu1 }
 0x23b   :  { %2399 = vmatmul.f32.gmra.mxu0 %v3780_v0  ;;  %v1966_v35 = vadd.f32 %v1965_v19, %v1898_v62 }
 0x23d   :  { %v2025_v37 = vadd.f32 %v2024_v5, %v1966_v35  ;;  %2464 = vmatmul.f32.gmra.mxu1 %v3788_v3 }
 0x23e   :  { %2527 = vmatmul.f32.gmra.mxu2 %v3790_v4 }
 0x23f   :  { %2578 = vmatmul.f32.gmra.mxu3 %v3790_v4  ;;  %v4284_v40 = vadd.f32 %v2089_v31, %v2025_v37 }
 0x240   :  { %v1906_v6 = vpop.f32.mrf.mxu0 }
 0x241   :  { %v2029_v33 = vpop.f32.mrf.mxu2 }
 0x242   :  { %v2095_v58 = vpop.f32.mrf.mxu3  ;;  %v1969_v24 = vpop.f32.mrf.mxu1 }
 0x243   :  { %2404 = vmatmul.f32.gmra.mxu0 %v3800_v7  ;;  %v1970_v48 = vadd.f32 %v1969_v24, %v1906_v6  ;;  %v3554_v6 = vld [vmem:[%s4522_s0 + $0x58] sm:$0xff] }
 0x244   :  { %v2978_v24 = vand.u32 4294901760, %v3554_v6 }
 0x245   :  { %v2030_v25 = vadd.f32 %v2029_v33, %v1970_v48  ;;  %2470 = vmatmul.f32.gmra.mxu1 %v3808_v11 }
 0x246   :  { %2531 = vmatmul.f32.gmra.mxu2 %v3810_v12 }
 0x247   :  { %2582 = vmatmul.f32.gmra.mxu3 %v3810_v12  ;;  %v4290_v23 = vadd.f32 %v2095_v58, %v2030_v25  ;;  %2979 = vmatpush.msra.mxu2 %v2978_v24 }
 0x248   :  { %v1914_v42 = vpop.f32.mrf.mxu0 }
 0x249   :  { %v2034_v1 = vpop.f32.mrf.mxu2 }
 0x24a   :  { %v2101_v38 = vpop.f32.mrf.mxu3  ;;  %v1973_v51 = vpop.f32.mrf.mxu1 }
 0x24b   :  { %2409 = vmatmul.f32.gmra.mxu0 %v3817_v14  ;;  %v1974_v62 = vadd.f32 %v1973_v51, %v1914_v42  ;;  %v3066_v51 = vsub.f32 %v3554_v6, %v2978_v24  ;;  %v3563_v6 = vld [vmem:[#allocation3 + $0x20] sm:$0xff] }
 0x24d   :  { %v2035_v31 = vadd.f32 %v2034_v1, %v1974_v62  ;;  %2476 = vmatmul.f32.gmra.mxu1 %v3824_v18 }
 0x24e   :  { %2750 = vmatmul.f32.vlgmr.msrb.gmra.mxu2 %v3683_v17 }
 0x24f   :  { %2810 = vmatmul.f32.vlgmr.msrb.gmra.mxu3 %v3692_v22  ;;  %v4296_v19 = vadd.f32 %v2101_v38, %v2035_v31  ;;  %3249 = vmatpush.msrb.mxu2 %v3061_v41  ;;  %v3067_v41 = vand.u32 4294901760, %v3066_v51 }
 0x250   :  { %v2128_v5 = vpop.f32.mrf.mxu0 }
 0x251   :  { %v2129_v26 = vadd.f32 %v2128_v5, %v4243_v56  ;;  %v2234_v37 = vpop.f32.mrf.mxu2  ;;  %3253 = vmatpush.msrb.mxu2 %v3067_v41 }
 0x252   :  { %v2321_v35 = vpop.f32.mrf.mxu3  ;;  %v2179_v36 = vpop.f32.mrf.mxu1 }
 0x253   :  { %2609 = vmatmul.f32.vlgmr.msrb.gmra.mxu0 %v3708_v32  ;;  %v4304_v58 = vadd.f32 %v2321_v35, %v2234_v37  ;;  %v2180_v33 = vadd.f32 %v2179_v36, %v2129_v26  ;;  %v3562_v36 = vld [vmem:[#allocation3] sm:$0xff] }
 0x254   :  { %3120 = vmatpush.msrb.mxu0 %v3060_v49 }
 0x255   :  { %2696 = vmatmul.f32.vlgmr.msrb.gmra.mxu1 %v3670_v9  ;;  %v3370_v25 = vmul.f32 0.01, %v2180_v33  ;;  %vm3338_vm5 = vcmp.gt.f32.partialorder %v2180_v33, 0.0 }
 0x256   :  { %2755 = vmatmul.f32.gmra.mxu2 %v3687_v20  ;;  %3180 = vmatpush.msrb.mxu1 %v4272_v34 }
 0x257   :  { %2816 = vmatmul.f32.gmra.mxu3 %v3699_v28  ;;  %3123 = vmatpush.msrb.mxu0 %v3066_v51  ;;  %v3402_v31 = vsel %vm3338_vm5, %v2180_v33, %v3370_v25 }
 0x258   :  { %v2132_v56 = vpop.f32.mrf.mxu0  ;;  %3182 = vmatpush.msrb.mxu1 %v2978_v24  ;;  %v3434_v37 = vmul.f32 %v3562_v36, %v3402_v31 }
 0x259   :  { %v2133_v48 = vadd.f32 %v2132_v56, %v4251_v13  ;;  %v2242_v49 = vpop.f32.mrf.mxu2  ;;  %v3068_v13 = vsub.f32 %v3066_v51, %v3067_v41 }
 0x25a   :  { %v2325_v42 = vpop.f32.mrf.mxu3  ;;  %v2183_v38 = vpop.f32.mrf.mxu1 }
 0x25b   :  { %2617 = vmatmul.f32.gmra.mxu0 %v3722_v43  ;;  %v2184_v1 = vadd.f32 %v2183_v38, %v2133_v48  ;;  %v4312_v62 = vadd.f32 %v2325_v42, %v2242_v49  ;;  %v3069_v42 = vand.u32 4294901760, %v3068_v13 }
 0x25d   :  { %vm3342_vm6 = vcmp.gt.f32.partialorder %v2184_v1, 0.0  ;;  %v3374_v5 = vmul.f32 0.01, %v2184_v1  ;;  %2700 = vmatmul.f32.gmra.mxu1 %v3680_v15  ;;  %3070 = vmatpush.msra.mxu3 %v3069_v42 }
 0x25e   :  { %2760 = vmatmul.f32.gmra.mxu2 %v3717_v39 }
 0x25f   :  { %2822 = vmatmul.f32.gmra.mxu3 %v3725_v44  ;;  %v3406_v26 = vsel %vm3342_vm6, %v2184_v1, %v3374_v5  ;;  %v3564_v5 = vld [vmem:[#allocation3 + $0x40] sm:$0xff] }
 0x260   :  { %v2136_v35 = vpop.f32.mrf.mxu0  ;;  %v3438_v56 = vmul.f32 %v3563_v6, %v3406_v26  ;;  %3302 = vmatpush.msrb.mxu3 %v4272_v34 }
 0x261   :  { %v2137_v48 = vadd.f32 %v2136_v35, %v4258_v30  ;;  %v2250_v49 = vpop.f32.mrf.mxu2 }
 0x262   :  { %v2329_v33 = vpop.f32.mrf.mxu3  ;;  %v3466_v25 = vadd.f32 %v3438_v56, %v3434_v37  ;;  %v2187_v38 = vpop.f32.mrf.mxu1  ;;  %3304 = vmatpush.msrb.mxu3 %v2978_v24 }
 0x263   :  { %2625 = vmatmul.f32.gmra.mxu0 %v3745_v52  ;;  %v2188_v51 = vadd.f32 %v2187_v38, %v2137_v48  ;;  %v4319_v41 = vadd.f32 %v2329_v33, %v2250_v49 }
 0x265   :  { %vm3346_vm7 = vcmp.gt.f32.partialorder %v2188_v51, 0.0  ;;  %v3378_v1 = vmul.f32 0.01, %v2188_v51  ;;  %2704 = vmatmul.f32.gmra.mxu1 %v3701_v29 }
 0x266   :  { %2765 = vmatmul.f32.gmra.mxu2 %v3739_v50 }
 0x267   :  { %2828 = vmatmul.f32.gmra.mxu3 %v3748_v53  ;;  %v3410_v30 = vsel %vm3346_vm7, %v2188_v51, %v3378_v1 }
 0x268   :  { %v2140_v31 = vpop.f32.mrf.mxu0  ;;  %v3442_v13 = vmul.f32 %v3564_v5, %v3410_v30 }
 0x269   :  { %v2141_v26 = vadd.f32 %v2140_v31, %v4264_v63  ;;  %v2258_v34 = vpop.f32.mrf.mxu2  ;;  %v3565_v63 = vld [vmem:[#allocation3 + $0x60] sm:$0xff] }
 0x26a   :  { %v2333_v35 = vpop.f32.mrf.mxu3  ;;  %v3467_v36 = vadd.f32 %v3466_v25, %v3442_v13  ;;  %v2191_v37 = vpop.f32.mrf.mxu1 }
 0x26b   :  { %2633 = vmatmul.f32.gmra.mxu0 %v3765_v59  ;;  %v2192_v6 = vadd.f32 %v2191_v37, %v2141_v26  ;;  %v4327_v56 = vadd.f32 %v2333_v35, %v2258_v34 }
 0x26d   :  { %vm3350_vm8 = vcmp.gt.f32.partialorder %v2192_v6, 0.0  ;;  %v3382_v24 = vmul.f32 0.01, %v2192_v6  ;;  %2708 = vmatmul.f32.gmra.mxu1 %v3727_v45 }
 0x26e   :  { %2770 = vmatmul.f32.gmra.mxu2 %v3760_v57 }
 0x26f   :  { %2834 = vmatmul.f32.gmra.mxu3 %v3768_v60  ;;  %v3414_v48 = vsel %vm3350_vm8, %v2192_v6, %v3382_v24 }
 0x270   :  { %v2144_v42 = vpop.f32.mrf.mxu0  ;;  %v3446_v33 = vmul.f32 %v3565_v63, %v3414_v48 }
 0x271   :  { %v2145_v25 = vadd.f32 %v2144_v42, %v4278_v46  ;;  %v2266_v1 = vpop.f32.mrf.mxu2  ;;  %v3566_v46 = vld [vmem:[#allocation3 + $0x80] sm:$0xff] }
 0x272   :  { %v2337_v38 = vpop.f32.mrf.mxu3  ;;  %v3468_v49 = vadd.f32 %v3467_v36, %v3446_v33  ;;  %v2195_v51 = vpop.f32.mrf.mxu1 }
 0x273   :  { %2641 = vmatmul.f32.gmra.mxu0 %v3785_v2  ;;  %v2196_v30 = vadd.f32 %v2195_v51, %v2145_v25  ;;  %v4334_v31 = vadd.f32 %v2337_v38, %v2266_v1 }
 0x275   :  { %vm3354_vm9 = vcmp.gt.f32.partialorder %v2196_v30, 0.0  ;;  %v3386_v5 = vmul.f32 0.01, %v2196_v30  ;;  %2712 = vmatmul.f32.gmra.mxu1 %v3750_v54 }
 0x276   :  { %2775 = vmatmul.f32.gmra.mxu2 %v3780_v0 }
 0x277   :  { %2840 = vmatmul.f32.gmra.mxu3 %v3788_v3  ;;  %v3418_v13 = vsel %vm3354_vm9, %v2196_v30, %v3386_v5 }
 0x278   :  { %v2148_v26 = vpop.f32.mrf.mxu0  ;;  %v3450_v35 = vmul.f32 %v3566_v46, %v3418_v13 }
 0x279   :  { %v2149_v36 = vadd.f32 %v2148_v26, %v4284_v40  ;;  %v2274_v24 = vpop.f32.mrf.mxu2  ;;  %v3567_v40 = vld [vmem:[#allocation3 + $0xa0] sm:$0xff] }
 0x27a   :  { %v2341_v37 = vpop.f32.mrf.mxu3  ;;  %v3469_v34 = vadd.f32 %v3468_v49, %v3450_v35  ;;  %v2199_v6 = vpop.f32.mrf.mxu1 }
 0x27b   :  { %2649 = vmatmul.f32.gmra.mxu0 %v3805_v10  ;;  %v2200_v48 = vadd.f32 %v2199_v6, %v2149_v36  ;;  %v4341_v42 = vadd.f32 %v2341_v37, %v2274_v24  ;;  %v1759_v24 = vrot.slane %v3996_v55, 4 }
 0x27d   :  { %vm3358_vm10 = vcmp.gt.f32.partialorder %v2200_v48, 0.0  ;;  %v3390_v63 = vmul.f32 0.01, %v2200_v48  ;;  %2716 = vmatmul.f32.gmra.mxu1 %v3770_v61 }
 0x27e   :  { %2780 = vmatmul.f32.gmra.mxu2 %v3800_v7 }
 0x27f   :  { %2846 = vmatmul.f32.gmra.mxu3 %v3808_v11  ;;  %v3422_v33 = vsel %vm3358_vm10, %v2200_v48, %v3390_v63 }
 0x280   :  { %v2152_v25 = vpop.f32.mrf.mxu0  ;;  %v3454_v38 = vmul.f32 %v3567_v40, %v3422_v33 }
 0x281   :  { %v2153_v49 = vadd.f32 %v2152_v25, %v4290_v23  ;;  %v2282_v5 = vpop.f32.mrf.mxu2  ;;  %v3568_v23 = vld [vmem:[#allocation3 + $0xc0] sm:$0xff] }
 0x282   :  { %v2345_v51 = vpop.f32.mrf.mxu3  ;;  %v3470_v1 = vadd.f32 %v3469_v34, %v3454_v38  ;;  %v2203_v30 = vpop.f32.mrf.mxu1 }
 0x283   :  { %2657 = vmatmul.f32.gmra.mxu0 %v3821_v16  ;;  %v2204_v13 = vadd.f32 %v2203_v30, %v2153_v49  ;;  %v4348_v26 = vadd.f32 %v2345_v51, %v2282_v5  ;;  %v1760_v49 = vadd.f32 %v1759_v24, %v3996_v55 }
 0x285   :  { %vm3362_vm11 = vcmp.gt.f32.partialorder %v2204_v13, 0.0  ;;  %v3394_v46 = vmul.f32 0.01, %v2204_v13  ;;  %2720 = vmatmul.f32.gmra.mxu1 %v3790_v4 }
 0x286   :  { %2785 = vmatmul.f32.gmra.mxu2 %v3817_v14 }
 0x287   :  { %2852 = vmatmul.f32.gmra.mxu3 %v3824_v18  ;;  %v3426_v35 = vsel %vm3362_vm11, %v2204_v13, %v3394_v46  ;;  %v1761_v46 = vrot.slane %v1760_v49, 2 }
 0x288   :  { %v2156_v36 = vpop.f32.mrf.mxu0  ;;  %v3458_v37 = vmul.f32 %v3568_v23, %v3426_v35 }
 0x289   :  { %v2157_v34 = vadd.f32 %v2156_v36, %v4296_v19  ;;  %v2290_v33 = vpop.f32.mrf.mxu2 }
 0x28a   :  { %v2349_v6 = vpop.f32.mrf.mxu3  ;;  %v3471_v48 = vadd.f32 %v3470_v1, %v3458_v37  ;;  %v2207_v63 = vpop.f32.mrf.mxu1  ;;  %v3569_v1 = vld [vmem:[#allocation3 + $0xe0] sm:$0xff] }
 0x28b   :  { %2665 = vmatmul.f32.gmra.mxu0 %v3832_v21  ;;  %v2208_v25 = vadd.f32 %v2207_v63, %v2157_v34  ;;  %v4356_v40 = vadd.f32 %v2349_v6, %v2290_v33 }
 0x28d   :  { %vm3366_vm12 = vcmp.gt.f32.partialorder %v2208_v25, 0.0  ;;  %v3398_v38 = vmul.f32 0.01, %v2208_v25  ;;  %2724 = vmatmul.f32.gmra.mxu1 %v3810_v12 }
 0x28e   :  { %2985 = vmatmul.f32.vlgmr.msra.gmra.mxu2 %v3708_v32  ;;  %v1762_v32 = vadd.f32 %v1761_v46, %v1760_v49 }
 0x28f   :  { %3072 = vmatmul.f32.vlgmr.msra.gmra.mxu3 %v3670_v9  ;;  %v3430_v19 = vsel %vm3366_vm12, %v2208_v25, %v3398_v38 }
 0x290   :  { %v2375_v51 = vpop.f32.mrf.mxu0  ;;  %v3462_v30 = vmul.f32 %v3569_v1, %v3430_v19  ;;  %v1763_v19 = vrot.slane %v1762_v32, 1 }
 0x291   :  { %v2376_v5 = vadd.f32 %v2375_v51, %v4304_v58  ;;  %v2504_v23 = vpop.f32.mrf.mxu2 }
 0x292   :  { %v2555_v13 = vpop.f32.mrf.mxu3  ;;  %v3472_v35 = vadd.f32 %v3471_v48, %v3462_v30  ;;  %v2435_v36 = vpop.f32.mrf.mxu1 }
 0x293   :  { %2879 = vmatmul.f32.vlgmr.msra.gmra.mxu0 %v3670_v9  ;;  %v2436_v37 = vadd.f32 %v2435_v36, %v2376_v5 }
 0x294   :  { %v3473_v34 = vrot.slane %v3472_v35, 4 }
 0x295   :  { %v2505_v55 = vadd.f32 %v2504_v23, %v2436_v37  ;;  %2930 = vmatmul.f32.vlgmr.msra.gmra.mxu1 %v3670_v9 }
 0x296   :  { %v3474_v6 = vadd.f32 %v3473_v34, %v3472_v35  ;;  %2993 = vmatmul.f32.gmra.mxu2 %v3722_v43  ;;  %v1764_v43 = vadd.f32 %v1763_v19, %v1762_v32 }
 0x297   :  { %3076 = vmatmul.f32.gmra.mxu3 %v3680_v15  ;;  %v2556_v24 = vadd.f32 %v2555_v13, %v2505_v55 }
 0x298   :  { %v2380_v63 = vpop.f32.mrf.mxu0  ;;  %v3475_v58 = vrot.slane %v3474_v6, 2 }
 0x299   :  { %v2381_v48 = vadd.f32 %v2380_v63, %v4312_v62  ;;  %v2508_v38 = vpop.f32.mrf.mxu2  ;;  %v3371_v5 = vmul.f32 0.01, %v2556_v24  ;;  %vm3339_vm15 = vcmp.gt.f32.partialorder %v2556_v24, 0.0 }
 0x29a   :  { %v2559_v33 = vpop.f32.mrf.mxu3  ;;  %v2441_v25 = vpop.f32.mrf.mxu1  ;;  %v3476_v51 = vadd.f32 %v3475_v58, %v3474_v6  ;;  %v3570_v58 = vld [vmem:[#allocation3 + $0x8] sm:$0xff] }
 0x29b   :  { %2883 = vmatmul.f32.gmra.mxu0 %v3680_v15  ;;  %v2442_v1 = vadd.f32 %v2441_v25, %v2381_v48  ;;  %v3403_v23 = vsel %vm3339_vm15, %v2556_v24, %v3371_v5 }
 0x29c   :  { %v3477_v30 = vrot.slane %v3476_v51, 1  ;;  %v3435_v48 = vmul.f32 %v3570_v58, %v3403_v23  ;;  %v3573_v58 = vld [vmem:[#allocation3 + $0x68] sm:$0xff] }
 0x29d   :  { %v2509_v35 = vadd.f32 %v2508_v38, %v2442_v1  ;;  %2934 = vmatmul.f32.gmra.mxu1 %v3680_v15 }
 0x29e   :  { %v3478_v49 = vadd.f32 %v3477_v30, %v3476_v51  ;;  %3001 = vmatmul.f32.gmra.mxu2 %v3745_v52 }
 0x29f   :  { %3080 = vmatmul.f32.gmra.mxu3 %v3701_v29  ;;  %v2560_v62 = vadd.f32 %v2559_v33, %v2509_v35  ;;  %v3571_v33 = vld [vmem:[#allocation3 + $0x28] sm:$0xff] }
 0x2a0   :  { %v2385_v13 = vpop.f32.mrf.mxu0  ;;  %v4374_v36 = vsel %vm3526_vm14, %v1764_v43, %v3478_v49  ;;  %v3572_v49 = vld [vmem:[#allocation3 + $0x48] sm:$0xff] }
 0x2a1   :  { %v2386_v46 = vadd.f32 %v2385_v13, %v4319_v41  ;;  %vm3343_vm1 = vcmp.gt.f32.partialorder %v2560_v62, 0.0  ;;  %v3375_v37 = vmul.f32 0.01, %v2560_v62  ;;  %v2512_v6 = vpop.f32.mrf.mxu2 }
 0x2a2   :  { %v2563_v34 = vpop.f32.mrf.mxu3  ;;  %v2447_v55 = vpop.f32.mrf.mxu1 }
 0x2a3   :  { %2887 = vmatmul.f32.gmra.mxu0 %v3701_v29  ;;  %v3407_v63 = vsel %vm3343_vm1, %v2560_v62, %v3375_v37  ;;  %v2448_v32 = vadd.f32 %v2447_v55, %v2386_v46 }
 0x2a4   :  { %v3439_v25 = vmul.f32 %v3571_v33, %v3407_v63 }
 0x2a5   :  { %v2513_v52 = vadd.f32 %v2512_v6, %v2448_v32  ;;  %2938 = vmatmul.f32.gmra.mxu1 %v3701_v29 }
 0x2a6   :  { %v3479_v41 = vadd.f32 %v3439_v25, %v3435_v48  ;;  %3009 = vmatmul.f32.gmra.mxu2 %v3765_v59 }
 0x2a7   :  { %3084 = vmatmul.f32.gmra.mxu3 %v3727_v45  ;;  %v2564_v24 = vadd.f32 %v2563_v34, %v2513_v52 }
 0x2a8   :  { %v2390_v38 = vpop.f32.mrf.mxu0 }
 0x2a9   :  { %v2391_v19 = vadd.f32 %v2390_v38, %v4327_v56  ;;  %vm3347_vm2 = vcmp.gt.f32.partialorder %v2564_v24, 0.0  ;;  %v3379_v51 = vmul.f32 0.01, %v2564_v24  ;;  %v2516_v5 = vpop.f32.mrf.mxu2 }
 0x2aa   :  { %v2567_v1 = vpop.f32.mrf.mxu3  ;;  %v2453_v30 = vpop.f32.mrf.mxu1 }
 0x2ab   :  { %2891 = vmatmul.f32.gmra.mxu0 %v3727_v45  ;;  %v3411_v35 = vsel %vm3347_vm2, %v2564_v24, %v3379_v51  ;;  %v2454_v43 = vadd.f32 %v2453_v30, %v2391_v19  ;;  %v3574_v30 = vld [vmem:[#allocation3 + $0x88] sm:$0xff] }
 0x2ac   :  { %v3443_v62 = vmul.f32 %v3572_v49, %v3411_v35 }
 0x2ad   :  { %v2517_v13 = vadd.f32 %v2516_v5, %v2454_v43  ;;  %2942 = vmatmul.f32.gmra.mxu1 %v3727_v45 }
 0x2ae   :  { %v3480_v46 = vadd.f32 %v3479_v41, %v3443_v62  ;;  %3017 = vmatmul.f32.gmra.mxu2 %v3785_v2 }
 0x2af   :  { %3088 = vmatmul.f32.gmra.mxu3 %v3750_v54  ;;  %v2568_v59 = vadd.f32 %v2567_v1, %v2517_v13 }
 0x2b0   :  { %v2395_v23 = vpop.f32.mrf.mxu0 }
 0x2b1   :  { %v2396_v56 = vadd.f32 %v2395_v23, %v4334_v31  ;;  %vm3351_vm3 = vcmp.gt.f32.partialorder %v2568_v59, 0.0  ;;  %v3383_v37 = vmul.f32 0.01, %v2568_v59  ;;  %v2520_v6 = vpop.f32.mrf.mxu2 }
 0x2b2   :  { %v2571_v34 = vpop.f32.mrf.mxu3  ;;  %v2459_v55 = vpop.f32.mrf.mxu1 }
 0x2b3   :  { %2895 = vmatmul.f32.gmra.mxu0 %v3750_v54  ;;  %v3415_v63 = vsel %vm3351_vm3, %v2568_v59, %v3383_v37  ;;  %v2460_v32 = vadd.f32 %v2459_v55, %v2396_v56  ;;  %v3575_v37 = vld [vmem:[#allocation3 + $0xa8] sm:$0xff] }
 0x2b4   :  { %v3447_v48 = vmul.f32 %v3573_v58, %v3415_v63 }
 0x2b5   :  { %v2521_v33 = vadd.f32 %v2520_v6, %v2460_v32  ;;  %2946 = vmatmul.f32.gmra.mxu1 %v3750_v54 }
 0x2b6   :  { %v3481_v25 = vadd.f32 %v3480_v46, %v3447_v48  ;;  %3025 = vmatmul.f32.gmra.mxu2 %v3805_v10 }
 0x2b7   :  { %3092 = vmatmul.f32.gmra.mxu3 %v3770_v61  ;;  %v2572_v2 = vadd.f32 %v2571_v34, %v2521_v33 }
 0x2b8   :  { %v2400_v52 = vpop.f32.mrf.mxu0 }
 0x2b9   :  { %v2401_v31 = vadd.f32 %v2400_v52, %v4341_v42  ;;  %vm3355_vm4 = vcmp.gt.f32.partialorder %v2572_v2, 0.0  ;;  %v3387_v41 = vmul.f32 0.01, %v2572_v2  ;;  %v2524_v19 = vpop.f32.mrf.mxu2  ;;  %v3576_v52 = vld [vmem:[#allocation3 + $0xc8] sm:$0xff] }
 0x2ba   :  { %v2575_v24 = vpop.f32.mrf.mxu3  ;;  %v2465_v38 = vpop.f32.mrf.mxu1 }
 0x2bb   :  { %2899 = vmatmul.f32.gmra.mxu0 %v3770_v61  ;;  %v3419_v51 = vsel %vm3355_vm4, %v2572_v2, %v3387_v41  ;;  %v2466_v1 = vadd.f32 %v2465_v38, %v2401_v31 }
 0x2bc   :  { %v3451_v5 = vmul.f32 %v3574_v30, %v3419_v51 }
 0x2bd   :  { %v2525_v35 = vadd.f32 %v2524_v19, %v2466_v1  ;;  %2950 = vmatmul.f32.gmra.mxu1 %v3770_v61 }
 0x2be   :  { %v3482_v43 = vadd.f32 %v3481_v25, %v3451_v5  ;;  %3033 = vmatmul.f32.gmra.mxu2 %v3821_v16 }
 0x2bf   :  { %3096 = vmatmul.f32.gmra.mxu3 %v3790_v4  ;;  %v2576_v10 = vadd.f32 %v2575_v24, %v2525_v35  ;;  %v1772_v24 = vrot.slane %v4051_v27, 4 }
 0x2c0   :  { %v2405_v49 = vpop.f32.mrf.mxu0 }
 0x2c1   :  { %v2406_v42 = vadd.f32 %v2405_v49, %v4348_v26  ;;  %vm3359_vm5 = vcmp.gt.f32.partialorder %v2576_v10, 0.0  ;;  %v3391_v62 = vmul.f32 0.01, %v2576_v10  ;;  %v2528_v59 = vpop.f32.mrf.mxu2  ;;  %v1773_v1 = vadd.f32 %v1772_v24, %v4051_v27 }
 0x2c2   :  { %v2579_v13 = vpop.f32.mrf.mxu3  ;;  %v2471_v46 = vpop.f32.mrf.mxu1 }
 0x2c3   :  { %2903 = vmatmul.f32.gmra.mxu0 %v3790_v4  ;;  %v3423_v23 = vsel %vm3359_vm5, %v2576_v10, %v3391_v62  ;;  %v2472_v56 = vadd.f32 %v2471_v46, %v2406_v42  ;;  %v3577_v10 = vld [vmem:[#allocation3 + $0xe8] sm:$0xff]  ;;  %v1774_v62 = vrot.slane %v1773_v1, 2 }
 0x2c4   :  { %v3455_v34 = vmul.f32 %v3575_v37, %v3423_v23 }
 0x2c5   :  { %v2529_v55 = vadd.f32 %v2528_v59, %v2472_v56  ;;  %2954 = vmatmul.f32.gmra.mxu1 %v3790_v4  ;;  %v1775_v37 = vadd.f32 %v1774_v62, %v1773_v1 }
 0x2c6   :  { %v3483_v6 = vadd.f32 %v3482_v43, %v3455_v34  ;;  %3041 = vmatmul.f32.gmra.mxu2 %v3832_v21 }
 0x2c7   :  { %3100 = vmatmul.f32.gmra.mxu3 %v3810_v12  ;;  %v2580_v16 = vadd.f32 %v2579_v13, %v2529_v55 }
 0x2c8   :  { %v2410_v63 = vpop.f32.mrf.mxu0 }
 0x2c9   :  { %v2411_v26 = vadd.f32 %v2410_v63, %v4356_v40  ;;  %vm3363_vm6 = vcmp.gt.f32.partialorder %v2580_v16, 0.0  ;;  %v3395_v32 = vmul.f32 0.01, %v2580_v16  ;;  %v2532_v33 = vpop.f32.mrf.mxu2 }
 0x2ca   :  { %v2583_v58 = vpop.f32.mrf.mxu3  ;;  %v2477_v48 = vpop.f32.mrf.mxu1 }
 0x2cb   :  { %2907 = vmatmul.f32.gmra.mxu0 %v3810_v12  ;;  %v3427_v25 = vsel %vm3363_vm6, %v2580_v16, %v3395_v32  ;;  %v2478_v2 = vadd.f32 %v2477_v48, %v2411_v26 }
 0x2cc   :  { %v3459_v31 = vmul.f32 %v3576_v52, %v3427_v25  ;;  %v3531_v52 = vsel %vm107_vm0, %v4374_v36, 0.0 }
 0x2cd   :  { %v2533_v41 = vadd.f32 %v2532_v33, %v2478_v2  ;;  %2958 = vmatmul.f32.gmra.mxu1 %v3810_v12 }
 0x2ce   :  { %v3484_v38 = vadd.f32 %v3483_v6, %v3459_v31  ;;  %3255 = vmatmul.f32.vlgmr.msrb.gmra.mxu2 %v3670_v9  ;;  %v1776_v6 = vrot.slane %v1775_v37, 1 }
 0x2cf   :  { %3306 = vmatmul.f32.vlgmr.msrb.gmra.mxu3 %v3670_v9  ;;  %v2584_v21 = vadd.f32 %v2583_v58, %v2533_v41 }
 0x2d0   :  { %v2610_v40 = vpop.f32.mrf.mxu0  ;;  %v1777_v48 = vadd.f32 %v1776_v6, %v1775_v37 }
 0x2d1   :  { %vm3367_vm7 = vcmp.gt.f32.partialorder %v2584_v21, 0.0  ;;  %v3399_v19 = vmul.f32 0.01, %v2584_v21  ;;  %v2751_v5 = vpop.f32.mrf.mxu2 }
 0x2d2   :  { %v2811_v51 = vpop.f32.mrf.mxu3  ;;  %v2697_v30 = vpop.f32.mrf.mxu1 }
 0x2d3   :  { %3126 = vmatmul.f32.vlgmr.msrb.gmra.mxu0 %v3683_v17  ;;  %v3431_v35 = vsel %vm3367_vm7, %v2584_v21, %v3399_v19  ;;  %v2698_v43 = vadd.f32 %v2697_v30, %v2610_v40 }
 0x2d4   :  { %v3463_v49 = vmul.f32 %v3577_v10, %v3431_v35 }
 0x2d5   :  { %v2752_v42 = vadd.f32 %v2751_v5, %v2698_v43  ;;  %3186 = vmatmul.f32.vlgmr.msrb.gmra.mxu1 %v3692_v22 }
 0x2d6   :  { %v3485_v13 = vadd.f32 %v3484_v38, %v3463_v49  ;;  %3259 = vmatmul.f32.gmra.mxu2 %v3680_v15 }
 0x2d7   :  { %3310 = vmatmul.f32.gmra.mxu3 %v3680_v15  ;;  %v4410_v9 = vadd.f32 %v2811_v51, %v2752_v42 }
 0x2d8   :  { %v2618_v46 = vpop.f32.mrf.mxu0  ;;  %v3486_v27 = vrot.slane %v3485_v13, 4 }
 0x2d9   :  { %v2756_v56 = vpop.f32.mrf.mxu2 }
 0x2da   :  { %v2817_v59 = vpop.f32.mrf.mxu3  ;;  %v3487_v17 = vadd.f32 %v3486_v27, %v3485_v13  ;;  %v2701_v23 = vpop.f32.mrf.mxu1 }
 0x2db   :  { %3131 = vmatmul.f32.gmra.mxu0 %v3687_v20  ;;  %v2702_v34 = vadd.f32 %v2701_v23, %v2618_v46 }
 0x2dc   :  { %v3488_v55 = vrot.slane %v3487_v17, 2 }
 0x2dd   :  { %v2757_v22 = vadd.f32 %v2756_v56, %v2702_v34  ;;  %3192 = vmatmul.f32.gmra.mxu1 %v3699_v28 }
 0x2de   :  { %v3489_v16 = vadd.f32 %v3488_v55, %v3487_v17  ;;  %3263 = vmatmul.f32.gmra.mxu2 %v3701_v29 }
 0x2df   :  { %3314 = vmatmul.f32.gmra.mxu3 %v3701_v29  ;;  %v4416_v63 = vadd.f32 %v2817_v59, %v2757_v22 }
 0x2e0   :  { %v2626_v15 = vpop.f32.mrf.mxu0  ;;  %v3490_v26 = vrot.slane %v3489_v16, 1 }
 0x2e1   :  { %v2761_v20 = vpop.f32.mrf.mxu2 }
 0x2e2   :  { %v2823_v32 = vpop.f32.mrf.mxu3  ;;  %v2705_v58 = vpop.f32.mrf.mxu1  ;;  %v3491_v33 = vadd.f32 %v3490_v26, %v3489_v16 }
 0x2e3   :  { %3136 = vmatmul.f32.gmra.mxu0 %v3717_v39  ;;  %v2706_v25 = vadd.f32 %v2705_v58, %v2626_v15 }
 0x2e4   :  { %v3528_v28 = vsel %vm3526_vm14, %v1777_v48, %v3491_v33 }
 0x2e5   :  { %v2762_v2 = vadd.f32 %v2761_v20, %v2706_v25  ;;  %3198 = vmatmul.f32.gmra.mxu1 %v3725_v44  ;;  %v3532_v31 = vsel %vm107_vm0, %v3528_v28, 0.0  ;;  %v3578_v25 = vld [vmem:[#allocation3 + $0x10] sm:$0xff] }
 0x2e6   :  { %v4426_v29 = vadd.f32 %v3532_v31, %v3531_v52  ;;  %3267 = vmatmul.f32.gmra.mxu2 %v3727_v45 }
 0x2e7   :  { %3318 = vmatmul.f32.gmra.mxu3 %v3727_v45  ;;  %v4428_v41 = vadd.f32 %v2823_v32, %v2762_v2  ;;  %v3579_v2 = vld [vmem:[#allocation3 + $0x30] sm:$0xff] }
 0x2e8   :  { %v2634_v39 = vpop.f32.mrf.mxu0 }
 0x2e9   :  { %v2766_v21 = vpop.f32.mrf.mxu2 }
 0x2ea   :  { %v2829_v24 = vpop.f32.mrf.mxu3  ;;  %v2709_v38 = vpop.f32.mrf.mxu1 }
 0x2eb   :  { %3141 = vmatmul.f32.gmra.mxu0 %v3739_v50  ;;  %v2710_v44 = vadd.f32 %v2709_v38, %v2634_v39 }
 0x2ed   :  { %v2767_v40 = vadd.f32 %v2766_v21, %v2710_v44  ;;  %3204 = vmatmul.f32.gmra.mxu1 %v3748_v53 }
 0x2ee   :  { %3271 = vmatmul.f32.gmra.mxu2 %v3750_v54 }
 0x2ef   :  { %3322 = vmatmul.f32.gmra.mxu3 %v3750_v54  ;;  %v4434_v36 = vadd.f32 %v2829_v24, %v2767_v40 }
 0x2f0   :  { %v2642_v19 = vpop.f32.mrf.mxu0 }
 0x2f1   :  { %v2771_v45 = vpop.f32.mrf.mxu2 }
 0x2f2   :  { %v2835_v51 = vpop.f32.mrf.mxu3  ;;  %v2713_v1 = vpop.f32.mrf.mxu1 }
 0x2f3   :  { %3146 = vmatmul.f32.gmra.mxu0 %v3760_v57  ;;  %v2714_v30 = vadd.f32 %v2713_v1, %v2642_v19  ;;  %v3580_v1 = vld [vmem:[#allocation3 + $0x50] sm:$0xff] }
 0x2f5   :  { %v2772_v5 = vadd.f32 %v2771_v45, %v2714_v30  ;;  %3210 = vmatmul.f32.gmra.mxu1 %v3768_v60 }
 0x2f6   :  { %3275 = vmatmul.f32.gmra.mxu2 %v3770_v61 }
 0x2f7   :  { %3326 = vmatmul.f32.gmra.mxu3 %v3770_v61  ;;  %v4440_v50 = vadd.f32 %v2835_v51, %v2772_v5 }
 0x2f8   :  { %v2650_v53 = vpop.f32.mrf.mxu0 }
 0x2f9   :  { %v2776_v54 = vpop.f32.mrf.mxu2 }
 0x2fa   :  { %v2841_v35 = vpop.f32.mrf.mxu3  ;;  %v2717_v43 = vpop.f32.mrf.mxu1 }
 0x2fb   :  { %3151 = vmatmul.f32.gmra.mxu0 %v3780_v0  ;;  %v2718_v10 = vadd.f32 %v2717_v43, %v2650_v53 }
 0x2fd   :  { %v2777_v49 = vadd.f32 %v2776_v54, %v2718_v10  ;;  %3216 = vmatmul.f32.gmra.mxu1 %v3788_v3 }
 0x2fe   :  { %3279 = vmatmul.f32.gmra.mxu2 %v3790_v4 }
 0x2ff   :  { %3330 = vmatmul.f32.gmra.mxu3 %v3790_v4  ;;  %v4446_v57 = vadd.f32 %v2841_v35, %v2777_v49 }
 0x300   :  { %v2658_v60 = vpop.f32.mrf.mxu0 }
 0x301   :  { %v2781_v61 = vpop.f32.mrf.mxu2 }
 0x302   :  { %v2847_v42 = vpop.f32.mrf.mxu3  ;;  %v2721_v62 = vpop.f32.mrf.mxu1 }
 0x303   :  { %3156 = vmatmul.f32.gmra.mxu0 %v3800_v7  ;;  %v2722_v13 = vadd.f32 %v2721_v62, %v2658_v60 }
 0x305   :  { %v2782_v46 = vadd.f32 %v2781_v61, %v2722_v13  ;;  %3222 = vmatmul.f32.gmra.mxu1 %v3808_v11 }
 0x306   :  { %3283 = vmatmul.f32.gmra.mxu2 %v3810_v12 }
 0x307   :  { %3334 = vmatmul.f32.gmra.mxu3 %v3810_v12  ;;  %v4452_v0 = vadd.f32 %v2847_v42, %v2782_v46  ;;  %v3581_v42 = vld [vmem:[#allocation3 + $0x70] sm:$0xff] }
 0x308   :  { %v2666_v3 = vpop.f32.mrf.mxu0 }
 0x309   :  { %v2786_v4 = vpop.f32.mrf.mxu2 }
 0x30a   :  { %v2853_v27 = vpop.f32.mrf.mxu3  ;;  %v2725_v59 = vpop.f32.mrf.mxu1 }
 0x30b   :  { %3161 = vmatmul.f32.gmra.mxu0 %v3817_v14  ;;  %v2726_v17 = vadd.f32 %v2725_v59, %v2666_v3 }
 0x30d   :  { %v2787_v23 = vadd.f32 %v2786_v4, %v2726_v17  ;;  %3228 = vmatmul.f32.gmra.mxu1 %v3824_v18 }
 0x30f   :  { %v4457_v7 = vadd.f32 %v2853_v27, %v2787_v23 }
 0x310   :  { %v2880_v56 = vpop.f32.mrf.mxu0 }
 0x311   :  { %v2881_v11 = vadd.f32 %v2880_v56, %v4410_v9  ;;  %v2986_v55 = vpop.f32.mrf.mxu2  ;;  %v3582_v56 = vld [vmem:[#allocation3 + $0x90] sm:$0xff] }
 0x312   :  { %v3073_v37 = vpop.f32.mrf.mxu3  ;;  %v2931_v34 = vpop.f32.mrf.mxu1 }
 0x313   :  { %v2932_v22 = vadd.f32 %v2931_v34, %v2881_v11  ;;  %v4460_v6 = vadd.f32 %v3073_v37, %v2986_v55 }
 0x315   :  { %v3372_v14 = vmul.f32 0.01, %v2932_v22  ;;  %vm3340_vm8 = vcmp.gt.f32.partialorder %v2932_v22, 0.0 }
 0x317   :  { %v3404_v20 = vsel %vm3340_vm8, %v2932_v22, %v3372_v14 }
 0x318   :  { %v2884_v12 = vpop.f32.mrf.mxu0  ;;  %v3436_v28 = vmul.f32 %v3578_v25, %v3404_v20 }
 0x319   :  { %v2885_v16 = vadd.f32 %v2884_v12, %v4416_v63  ;;  %v2994_v32 = vpop.f32.mrf.mxu2 }
 0x31a   :  { %v3077_v15 = vpop.f32.mrf.mxu3  ;;  %v2935_v26 = vpop.f32.mrf.mxu1 }
 0x31b   :  { %v2936_v18 = vadd.f32 %v2935_v26, %v2885_v16  ;;  %v4463_v58 = vadd.f32 %v3077_v15, %v2994_v32  ;;  %v3583_v32 = vld [vmem:[#allocation3 + $0xb0] sm:$0xff] }
 0x31d   :  { %vm3344_vm9 = vcmp.gt.f32.partialorder %v2936_v18, 0.0  ;;  %v3376_v9 = vmul.f32 0.01, %v2936_v18 }
 0x31f   :  { %v3408_v48 = vsel %vm3344_vm9, %v2936_v18, %v3376_v9 }
 0x320   :  { %v2888_v33 = vpop.f32.mrf.mxu0  ;;  %v3440_v52 = vmul.f32 %v3579_v2, %v3408_v48 }
 0x321   :  { %v2889_v31 = vadd.f32 %v2888_v33, %v4428_v41  ;;  %v3002_v38 = vpop.f32.mrf.mxu2 }
 0x322   :  { %v3081_v63 = vpop.f32.mrf.mxu3  ;;  %v3492_v39 = vadd.f32 %v3440_v52, %v3436_v28  ;;  %v2939_v24 = vpop.f32.mrf.mxu1 }
 0x323   :  { %v2940_v21 = vadd.f32 %v2939_v24, %v2889_v31  ;;  %v4466_v44 = vadd.f32 %v3081_v63, %v3002_v38  ;;  %v3584_v31 = vld [vmem:[#allocation3 + $0xd0] sm:$0xff] }
 0x325   :  { %vm3348_vm10 = vcmp.gt.f32.partialorder %v2940_v21, 0.0  ;;  %v3380_v40 = vmul.f32 0.01, %v2940_v21 }
 0x327   :  { %v3412_v19 = vsel %vm3348_vm10, %v2940_v21, %v3380_v40  ;;  %vm3536_vm10 = vcmask 123904  }
 0x328   :  { %v2892_v51 = vpop.f32.mrf.mxu0  ;;  %v3444_v45 = vmul.f32 %v3580_v1, %v3412_v19 }
 0x329   :  { %v2893_v30 = vadd.f32 %v2892_v51, %v4434_v36  ;;  %v3010_v43 = vpop.f32.mrf.mxu2 }
 0x32a   :  { %v3085_v5 = vpop.f32.mrf.mxu3  ;;  %v3493_v53 = vadd.f32 %v3492_v39, %v3444_v45  ;;  %v2943_v35 = vpop.f32.mrf.mxu1 }
 0x32b   :  { %v2944_v41 = vadd.f32 %v2943_v35, %v2893_v30  ;;  %v4469_v54 = vadd.f32 %v3085_v5, %v3010_v43  ;;  %v3585_v5 = vld [vmem:[#allocation3 + $0xf0] sm:$0xff] }
 0x32d   :  { %vm3352_vm11 = vcmp.gt.f32.partialorder %v2944_v41, 0.0  ;;  %v3384_v10 = vmul.f32 0.01, %v2944_v41 }
 0x32f   :  { %v3416_v49 = vsel %vm3352_vm11, %v2944_v41, %v3384_v10 }
 0x330   :  { %v2896_v60 = vpop.f32.mrf.mxu0  ;;  %v3448_v62 = vmul.f32 %v3581_v42, %v3416_v49 }
 0x331   :  { %v2897_v61 = vadd.f32 %v2896_v60, %v4440_v50  ;;  %v3018_v27 = vpop.f32.mrf.mxu2 }
 0x332   :  { %v3089_v13 = vpop.f32.mrf.mxu3  ;;  %v3494_v46 = vadd.f32 %v3493_v53, %v3448_v62  ;;  %v2947_v3 = vpop.f32.mrf.mxu1 }
 0x333   :  { %v2948_v36 = vadd.f32 %v2947_v3, %v2897_v61  ;;  %v4472_v59 = vadd.f32 %v3089_v13, %v3018_v27 }
 0x335   :  { %vm3356_vm12 = vcmp.gt.f32.partialorder %v2948_v36, 0.0  ;;  %v3388_v4 = vmul.f32 0.01, %v2948_v36 }
 0x337   :  { %v3420_v17 = vsel %vm3356_vm12, %v2948_v36, %v3388_v4 }
 0x338   :  { %v2900_v23 = vpop.f32.mrf.mxu0  ;;  %v3452_v11 = vmul.f32 %v3582_v56, %v3420_v17 }
 0x339   :  { %v2901_v37 = vadd.f32 %v2900_v23, %v4446_v57  ;;  %v3026_v12 = vpop.f32.mrf.mxu2 }
 0x33a   :  { %v3093_v34 = vpop.f32.mrf.mxu3  ;;  %v3495_v55 = vadd.f32 %v3494_v46, %v3452_v11  ;;  %v2951_v22 = vpop.f32.mrf.mxu1 }
 0x33b   :  { %v2952_v50 = vadd.f32 %v2951_v22, %v2901_v37  ;;  %v4475_v16 = vadd.f32 %v3093_v34, %v3026_v12 }
 0x33d   :  { %vm3360_vm15 = vcmp.gt.f32.partialorder %v2952_v50, 0.0  ;;  %v3392_v14 = vmul.f32 0.01, %v2952_v50 }
 0x33f   :  { %v3424_v15 = vsel %vm3360_vm15, %v2952_v50, %v3392_v14 }
 0x340   :  { %v2904_v26 = vpop.f32.mrf.mxu0  ;;  %v3456_v18 = vmul.f32 %v3583_v32, %v3424_v15 }
 0x341   :  { %v2905_v20 = vadd.f32 %v2904_v26, %v4452_v0  ;;  %v4480_v57 = vpop.f32.mrf.mxu2  ;;  %v1785_v0 = vrot.slane %v4171_v47, 4 }
 0x342   :  { %v4478_v9 = vpop.f32.mrf.mxu3  ;;  %v3496_v48 = vadd.f32 %v3495_v55, %v3456_v18  ;;  %v2955_v33 = vpop.f32.mrf.mxu1 }
 0x343   :  { %v2956_v25 = vadd.f32 %v2955_v33, %v2905_v20  ;;  %v1786_v1 = vadd.f32 %v1785_v0, %v4171_v47  ;;  %v3586_v20 = vld [vmem:[#allocation3 + $0x18] sm:$0xff] }
 0x345   :  { %vm3364_vm1 = vcmp.gt.f32.partialorder %v2956_v25, 0.0  ;;  %v3396_v28 = vmul.f32 0.01, %v2956_v25  ;;  %v1787_v49 = vrot.slane %v1786_v1, 2 }
 0x347   :  { %v3428_v2 = vsel %vm3364_vm1, %v2956_v25, %v3396_v28  ;;  %v1788_v13 = vadd.f32 %v1787_v49, %v1786_v1 }
 0x348   :  { %v2908_v52 = vpop.f32.mrf.mxu0  ;;  %v3460_v63 = vmul.f32 %v3584_v31, %v3428_v2  ;;  %v3587_v31 = vld [vmem:[#allocation3 + $0x38] sm:$0xff] }
 0x349   :  { %v2909_v39 = vadd.f32 %v2908_v52, %v4457_v7  ;;  %v4486_v40 = vpop.f32.mrf.mxu2  ;;  %v1789_v23 = vrot.slane %v1788_v13, 1 }
 0x34a   :  { %v4483_v24 = vpop.f32.mrf.mxu3  ;;  %v3497_v38 = vadd.f32 %v3496_v48, %v3460_v63  ;;  %v2959_v21 = vpop.f32.mrf.mxu1 }
 0x34b   :  { %v2960_v19 = vadd.f32 %v2959_v21, %v2909_v39  ;;  %v1790_v55 = vadd.f32 %v1789_v23, %v1788_v13 }
 0x34d   :  { %vm3368_vm2 = vcmp.gt.f32.partialorder %v2960_v19, 0.0  ;;  %v3400_v51 = vmul.f32 0.01, %v2960_v19 }
 0x34f   :  { %v3432_v45 = vsel %vm3368_vm2, %v2960_v19, %v3400_v51 }
 0x350   :  { %v3127_v30 = vpop.f32.mrf.mxu0  ;;  %v3464_v53 = vmul.f32 %v3585_v5, %v3432_v45 }
 0x351   :  { %v3128_v35 = vadd.f32 %v3127_v30, %v4460_v6  ;;  %v3256_v10 = vpop.f32.mrf.mxu2 }
 0x352   :  { %v3307_v7 = vpop.f32.mrf.mxu3  ;;  %v3498_v43 = vadd.f32 %v3497_v38, %v3464_v53  ;;  %v3187_v41 = vpop.f32.mrf.mxu1 }
 0x353   :  { %v3188_v60 = vadd.f32 %v3187_v41, %v3128_v35  ;;  %v3588_v35 = vld [vmem:[#allocation3 + $0x58] sm:$0xff] }
 0x354   :  { %v3499_v42 = vrot.slane %v3498_v43, 4 }
 0x355   :  { %v3257_v62 = vadd.f32 %v3256_v10, %v3188_v60 }
 0x356   :  { %v3500_v61 = vadd.f32 %v3499_v42, %v3498_v43 }
 0x357   :  { %v3308_v46 = vadd.f32 %v3307_v7, %v3257_v62 }
 0x358   :  { %v3132_v3 = vpop.f32.mrf.mxu0  ;;  %v3501_v27 = vrot.slane %v3500_v61, 2 }
 0x359   :  { %v3133_v47 = vadd.f32 %v3132_v3, %v4463_v58  ;;  %v3260_v17 = vpop.f32.mrf.mxu2  ;;  %v3373_v56 = vmul.f32 0.01, %v3308_v46  ;;  %vm3341_vm3 = vcmp.gt.f32.partialorder %v3308_v46, 0.0 }
 0x35a   :  { %v3311_v36 = vpop.f32.mrf.mxu3  ;;  %v3193_v4 = vpop.f32.mrf.mxu1  ;;  %v3502_v6 = vadd.f32 %v3501_v27, %v3500_v61  ;;  %v3589_v27 = vld [vmem:[#allocation3 + $0x78] sm:$0xff] }
 0x35b   :  { %v3194_v11 = vadd.f32 %v3193_v4, %v3133_v47  ;;  %v3405_v12 = vsel %vm3341_vm3, %v3308_v46, %v3373_v56 }
 0x35c   :  { %v3503_v37 = vrot.slane %v3502_v6, 1  ;;  %v3437_v48 = vmul.f32 %v3586_v20, %v3405_v12  ;;  %v3590_v12 = vld [vmem:[#allocation3 + $0x98] sm:$0xff] }
 0x35d   :  { %v3261_v34 = vadd.f32 %v3260_v17, %v3194_v11 }
 0x35e   :  { %v3504_v22 = vadd.f32 %v3503_v37, %v3502_v6 }
 0x35f   :  { %v3312_v50 = vadd.f32 %v3311_v36, %v3261_v34 }
 0x360   :  { %v3137_v14 = vpop.f32.mrf.mxu0  ;;  %v3529_v26 = vsel %vm3526_vm14, %v1790_v55, %v3504_v22 }
 0x361   :  { %v3138_v15 = vadd.f32 %v3137_v14, %v4466_v44  ;;  %vm3345_vm4 = vcmp.gt.f32.partialorder %v3312_v50, 0.0  ;;  %v3377_v58 = vmul.f32 0.01, %v3312_v50  ;;  %v3534_v18 = vsel %vm107_vm0, %v3529_v26, 0.0  ;;  %v3264_v25 = vpop.f32.mrf.mxu2 }
 0x362   :  { %v3315_v32 = vpop.f32.mrf.mxu3  ;;  %v3199_v33 = vpop.f32.mrf.mxu1  ;;  %v4495_v28 = vadd.f32 %v3534_v18, %v4426_v29  ;;  %v3505_v44 = vsel %vm1791_vm13, %v3437_v48, 0.0 }
 0x363   :  { %v3409_v2 = vsel %vm3345_vm4, %v3312_v50, %v3377_v58  ;;  %v3200_v52 = vadd.f32 %v3199_v33, %v3138_v15  ;;  %v3098_v15 = vadd.f32 %v4478_v9, %v4480_v57 }
 0x364   :  { %v3441_v63 = vmul.f32 %v3587_v31, %v3409_v2  ;;  %v3591_v31 = vld [vmem:[#allocation3 + $0xb8] sm:$0xff] }
 0x365   :  { %v3265_v39 = vadd.f32 %v3264_v25, %v3200_v52 }
 0x366   :  { %v3506_v38 = vsel %vm1791_vm13, %v3441_v63, 0.0 }
 0x367   :  { %v3507_v0 = vadd.f32 %v3506_v38, %v3505_v44  ;;  %v3316_v21 = vadd.f32 %v3315_v32, %v3265_v39  ;;  %v3102_v44 = vadd.f32 %v4483_v24, %v4486_v40  ;;  %v1807_v40 = vrot.slane %v4246_v8, 4 }
 0x368   :  { %v3142_v19 = vpop.f32.mrf.mxu0 }
 0x369   :  { %v3143_v51 = vadd.f32 %v3142_v19, %v4469_v54  ;;  %vm3349_vm0 = vcmp.gt.f32.partialorder %v3316_v21, 0.0  ;;  %v3381_v1 = vmul.f32 0.01, %v3316_v21  ;;  %v3268_v29 = vpop.f32.mrf.mxu2 }
 0x36a   :  { %v3319_v45 = vpop.f32.mrf.mxu3  ;;  %v3205_v30 = vpop.f32.mrf.mxu1 }
 0x36b   :  { %v3413_v5 = vsel %vm3349_vm0, %v3316_v21, %v3381_v1  ;;  %v3206_v53 = vadd.f32 %v3205_v30, %v3143_v51 }
 0x36c   :  { %v3445_v7 = vmul.f32 %v3588_v35, %v3413_v5 }
 0x36d   :  { %v3269_v43 = vadd.f32 %v3268_v29, %v3206_v53  ;;  %v3592_v29 = vld [vmem:[#allocation3 + $0xd8] sm:$0xff] }
 0x36e   :  { %v3508_v41 = vsel %vm1791_vm13, %v3445_v7, 0.0 }
 0x36f   :  { %v3509_v10 = vadd.f32 %v3508_v41, %v3507_v0  ;;  %v3320_v49 = vadd.f32 %v3319_v45, %v3269_v43 }
 0x370   :  { %v3147_v60 = vpop.f32.mrf.mxu0 }
 0x371   :  { %v3148_v42 = vadd.f32 %v3147_v60, %v4472_v59  ;;  %vm3353_vm5 = vcmp.gt.f32.partialorder %v3320_v49, 0.0  ;;  %v3385_v62 = vmul.f32 0.01, %v3320_v49  ;;  %v3272_v13 = vpop.f32.mrf.mxu2  ;;  %v3593_v60 = vld [vmem:[#allocation3 + $0xf8] sm:$0xff] }
 0x372   :  { %v3323_v54 = vpop.f32.mrf.mxu3  ;;  %v3211_v61 = vpop.f32.mrf.mxu1 }
 0x373   :  { %v3417_v46 = vsel %vm3353_vm5, %v3320_v49, %v3385_v62  ;;  %v3212_v3 = vadd.f32 %v3211_v61, %v3148_v42  ;;  %v1808_v49 = vadd.f32 %v1807_v40, %v4246_v8 }
 0x374   :  { %v3449_v47 = vmul.f32 %v3589_v27, %v3417_v46 }
 0x375   :  { %v3273_v36 = vadd.f32 %v3272_v13, %v3212_v3  ;;  %v1809_v61 = vrot.slane %v1808_v49, 2 }
 0x376   :  { %v3510_v4 = vsel %vm1791_vm13, %v3449_v47, 0.0 }
 0x377   :  { %v3511_v17 = vadd.f32 %v3510_v4, %v3509_v10  ;;  %v3324_v23 = vadd.f32 %v3323_v54, %v3273_v36  ;;  %v1810_v46 = vadd.f32 %v1809_v61, %v1808_v49 }
 0x378   :  { %v3152_v6 = vpop.f32.mrf.mxu0 }
 0x379   :  { %v3153_v56 = vadd.f32 %v3152_v6, %v4475_v16  ;;  %vm3357_vm6 = vcmp.gt.f32.partialorder %v3324_v23, 0.0  ;;  %v3389_v11 = vmul.f32 0.01, %v3324_v23  ;;  %v3276_v34 = vpop.f32.mrf.mxu2  ;;  %v1811_v47 = vrot.slane %v1810_v46, 1 }
 0x37a   :  { %v3327_v59 = vpop.f32.mrf.mxu3  ;;  %v3217_v37 = vpop.f32.mrf.mxu1 }
 0x37b   :  { %v3421_v55 = vsel %vm3357_vm6, %v3324_v23, %v3389_v11  ;;  %v3218_v22 = vadd.f32 %v3217_v37, %v3153_v56  ;;  %v3542_v11 = vstv %s4525_s3 }
 0x37c   :  { %v3453_v50 = vmul.f32 %v3590_v12, %v3421_v55 }
 0x37d   :  { %v3277_v14 = vadd.f32 %v3276_v34, %v3218_v22 }
 0x37e   :  { %v3512_v26 = vsel %vm1791_vm13, %v3453_v50, 0.0 }
 0x37f   :  { %v3513_v58 = vadd.f32 %v3512_v26, %v3511_v17  ;;  %v3328_v32 = vadd.f32 %v3327_v59, %v3277_v14  ;;  %v1812_v17 = vadd.f32 %v1811_v47, %v1810_v46 }
 0x380   :  { %v3157_v18 = vpop.f32.mrf.mxu0 }
 0x381   :  { %v3158_v20 = vadd.f32 %v3157_v18, %v3098_v15  ;;  %vm3361_vm7 = vcmp.gt.f32.partialorder %v3328_v32, 0.0  ;;  %v3393_v16 = vmul.f32 0.01, %v3328_v32  ;;  %v3280_v25 = vpop.f32.mrf.mxu2 }
 0x382   :  { %v3331_v48 = vpop.f32.mrf.mxu3  ;;  %v3223_v33 = vpop.f32.mrf.mxu1 }
 0x383   :  { %v3425_v2 = vsel %vm3361_vm7, %v3328_v32, %v3393_v16  ;;  %v3224_v52 = vadd.f32 %v3223_v33, %v3158_v20 }
 0x384   :  { %v3457_v63 = vmul.f32 %v3591_v31, %v3425_v2 }
 0x385   :  { %v3281_v39 = vadd.f32 %v3280_v25, %v3224_v52 }
 0x386   :  { %v3514_v9 = vsel %vm1791_vm13, %v3457_v63, 0.0 }
 0x387   :  { %v3515_v57 = vadd.f32 %v3514_v9, %v3513_v58  ;;  %v3332_v38 = vadd.f32 %v3331_v48, %v3281_v39 }
 0x388   :  { %v3162_v0 = vpop.f32.mrf.mxu0 }
 0x389   :  { %v3163_v21 = vadd.f32 %v3162_v0, %v3102_v44  ;;  %vm3365_vm8 = vcmp.gt.f32.partialorder %v3332_v38, 0.0  ;;  %v3397_v19 = vmul.f32 0.01, %v3332_v38  ;;  %v3284_v1 = vpop.f32.mrf.mxu2 }
 0x38a   :  { %v3229_v51 = vpop.f32.mrf.mxu1  ;;  %v3335_v53 = vpop.f32.mrf.mxu3 }
 0x38b   :  { %v3429_v45 = vsel %vm3365_vm8, %v3332_v38, %v3397_v19  ;;  %v3230_v30 = vadd.f32 %v3229_v51, %v3163_v21 }
 0x38c   :  { %v3461_v5 = vmul.f32 %v3592_v29, %v3429_v45 }
 0x38d   :  { %v3285_v35 = vadd.f32 %v3284_v1, %v3230_v30 }
 0x38e   :  { %v3516_v7 = vsel %vm1791_vm13, %v3461_v5, 0.0 }
 0x38f   :  { %v3517_v43 = vadd.f32 %v3516_v7, %v3515_v57  ;;  %v3336_v24 = vadd.f32 %v3335_v53, %v3285_v35 }
 0x391   :  { %vm3369_vm9 = vcmp.gt.f32.partialorder %v3336_v24, 0.0  ;;  %v3401_v41 = vmul.f32 0.01, %v3336_v24 }
 0x393   :  { %v3433_v10 = vsel %vm3369_vm9, %v3336_v24, %v3401_v41 }
 0x394   :  { %v3465_v42 = vmul.f32 %v3593_v60, %v3433_v10 }
 0x396   :  { %v3518_v62 = vsel %vm1791_vm13, %v3465_v42, 0.0  ;;  %vm3544_vm13 = vcmask 1024  }
 0x397   :  { %v3519_v54 = vadd.f32 %v3518_v62, %v3517_v43 }
 0x399   :  { %v3520_v13 = vrot.slane %v3519_v54, 4 }
 0x39b   :  { %v3521_v3 = vadd.f32 %v3520_v13, %v3519_v54 }
 0x39d   :  { %v3522_v27 = vrot.slane %v3521_v3, 2 }
 0x39f   :  { %v3523_v36 = vadd.f32 %v3522_v27, %v3521_v3 }
 0x3a1   :  { %v3524_v4 = vrot.slane %v3523_v36, 1 }
 0x3a3   :  { %v3525_v23 = vadd.f32 %v3524_v4, %v3523_v36 }
 0x3a5   :  { %v3530_v6 = vsel %vm3526_vm14, %v1812_v17, %v3525_v23 }
 0x3a6   :  { %v3537_v56 = vsel %vm3536_vm10, %v3530_v6, 0.0 }
 0x3a7   :  { %v3538_v8 = vadd.f32 %v3537_v56, %v4495_v28 }
 0x3a9   :  { %3539 = vadd.xlane.f32.xlu0 %v3538_v8 }
 0x41c   :  { %v3540_v59 = vpop.xlane.xlu0 %3539 }
 0x41d   :  { %v3543_v37 = vadd.f32 %v3542_v11, %v3540_v59 }
 0x41f   :  { %3545 = vst.msk [vmem:[%s4526_s4] sm:$0x3] %vm3544_vm13, %v3543_v37 }
 0x420   :  { %3550 = vsyncpa [#allocation4], 1 }

</bundles_post_ra>
